<compile_context>
chip_gen: v6e
topology: v6e:2x2x1
jax: 0.10.0
libtpu: 0.0.40
codegen_flags: <defaults>
</compile_context>

<pallas_src>
import jax
import jax.numpy as jnp
from jax import lax
from jax.experimental import pallas as pl
from jax.experimental.pallas import tpu as pltpu


# ----------------------------- model dims ----------------------------------
SRC_VOCAB = 30
TRG_VOCAB = 32
EMB_DIM = 16
HID_DIM = 32
BATCH = 8
SRC_LEN = 7
TRG_LEN = 6
TEACHER_FORCING_RATIO = 0.5

V_PAD = ((TRG_VOCAB + 127) // 128) * 128          # lane-dense logits width (=128)
GATE_PAD = 128 + 3 * HID_DIM                      # gi at lanes [0,3H), gh at [128,128+3H)
_NEG = -1e30                                      # padded-logit value (folded into bo)


def _gru_step(gi, gh, bhn_b, h, H):
    """PyTorch GRU cell. gi already contains b_ih + [b_hr, b_hz, 0]; gh has no bias.
    One fused sigmoid over the r|z lanes; b_hn stays inside r*(...)."""
    rz = jax.nn.sigmoid(gi[:, :2 * H] + gh[:, :2 * H])
    r = rz[:, :H]
    z = rz[:, H:]
    n = jnp.tanh(gi[:, 2 * H:] + r * (gh[:, 2 * H:] + bhn_b))
    return (1.0 - z) * n + z * h


# --------------------------- fused forward kernel ---------------------------
def seq2seq_kernel(tf_ref, len_ref, gi_enc_ref, trg_ref,
                   slab96_ref, gates_ref, slab128_ref, bias_ref,
                   out_ref, inp_ref):
    B = len_ref.shape[0]
    H = slab96_ref.shape[1] // 3
    T = gi_enc_ref.shape[0]
    V = gates_ref.shape[0] - H
    trg_len = out_ref.shape[0]
    Vp = out_ref.shape[-1]
    gh_off = gates_ref.shape[1] - 3 * H           # lane offset of the gh block (=128)

    f32 = jnp.float32
    bf16 = jnp.bfloat16

    # ---- one-time weight/bias loads (tiny, stay resident in vregs) ----
    enc_whh = slab96_ref[0:H, :]                  # (H, 3H)   bf16
    wih_c = slab96_ref[H:2 * H, :]                # (H, 3H)   bf16
    w_gates = gates_ref[...]                      # (V+H,224) bf16  blockdiag(M1, whh)
    w_pred = slab128_ref[0:V + H, :]              # (V+H,128) bf16  vstack(M2, wo_h)
    wo_c = slab128_ref[V + H:V + 2 * H, :]        # (H, 128)  bf16

    dec_gi_bias = bias_ref[0:1, 0:3 * H]          # (1, 3H) f32  = bih + [bhh_r, bhh_z, 0]
    bo_row = bias_ref[1:2, 0:Vp]                  # (1, Vp) f32  (pad lanes = -1e30)
    enc_bhn_b = jnp.broadcast_to(bias_ref[2:3, 0:H], (B, H))   # hoisted broadcasts
    dec_bhn_b = jnp.broadcast_to(bias_ref[3:4, 0:H], (B, H))

    # ------------------------------ encoder ---------------------------------
    # gi_enc (input projections + folded r/z biases) precomputed in the wrapper.
    lens_b = jnp.broadcast_to(len_ref[...], (B, H))            # (B, H) int32

    h = jnp.zeros((B, H), f32)
    for t in range(T):                            # short static loop, fully unrolled
        gi = gi_enc_ref[t]                        # (B, 3H) f32
        gh = jnp.dot(h.astype(bf16), enc_whh, preferred_element_type=f32)
        h_new = _gru_step(gi, gh, enc_bhn_b, h, H)
        # packed-sequence semantics: freeze hidden once t >= src_lengths[b]
        h = jnp.where(lens_b > t, h_new, h)
    context = h                                   # (B, H) f32

    # ------------------------------ decoder ---------------------------------
    # Loop-invariant context projections (one dot each, outside the decode loop).
    ctx_bf = context.astype(bf16)
    gi_ctx = jnp.dot(ctx_bf, wih_c, preferred_element_type=f32) + dec_gi_bias
    pred_ctx = jnp.dot(ctx_bf, wo_c, preferred_element_type=f32) + bo_row

    vocab_iota = lax.broadcasted_iota(jnp.int32, (B, V), 1)
    pad_iota = lax.broadcasted_iota(jnp.int32, (B, Vp), 1)

    out_ref[0] = jnp.zeros((B, Vp), f32)          # outputs[0] stays zeros
    inp_ref[...] = trg_ref[:, 0:1]                # <sos> tokens

    hidden = context
    for t in range(1, trg_len):
        one_hot = (inp_ref[...] == vocab_iota).astype(f32)     # exact selector (B, V)

        # 1 fused dot: gi_emb (lanes [0,3H)) and gh (lanes [128,128+3H))
        x_g = jnp.concatenate([one_hot, hidden], axis=1).astype(bf16)
        gates = jnp.dot(x_g, w_gates, preferred_element_type=f32)
        gi = gates[:, 0:3 * H] + gi_ctx
        gh = gates[:, gh_off:gh_off + 3 * H]
        hidden = _gru_step(gi, gh, dec_bhn_b, hidden, H)

        # 1 fused dot for fc_out(emb, hidden, context); ctx+bias precomputed
        x_p = jnp.concatenate([one_hot, hidden], axis=1).astype(bf16)
        pred = jnp.dot(x_p, w_pred, preferred_element_type=f32) + pred_ctx
        out_ref[t] = pred                         # lane-dense (8,128) store

        if t < trg_len - 1:                       # last step's next-input is dead
            tf_t = tf_ref[t]

            @pl.when(tf_t != 0)                   # teacher forcing: take target token
            def _():
                inp_ref[...] = trg_ref[:, t:t + 1]

            @pl.when(tf_t == 0)                   # greedy: argmax (pad lanes = -1e30)
            def _():
                mx = jnp.max(pred, axis=1, keepdims=True)
                top1 = jnp.min(jnp.where(pred == mx, pad_iota, Vp),
                               axis=1, keepdims=True)           # first-occurrence
                inp_ref[...] = top1


# ------------------------------ wrapper --------------------------------------
def _pad_cols(w, width):
    return jnp.pad(w, ((0, 0), (0, width - w.shape[-1])))


def _seq2seq_forward(src, src_lengths, trg, params,
                     teacher_forcing_ratio=TEACHER_FORCING_RATIO,
                     tf_key=None):
    if tf_key is None:
        tf_key = jax.random.PRNGKey(1234)
    src_len, batch = src.shape
    trg_len = trg.shape[0]
    H, E, V = HID_DIM, EMB_DIM, TRG_VOCAB

    # ---- one-time glue / precompute (fused XLA ops under jit) ----------------
    lens2d = src_lengths.reshape(batch, 1).astype(jnp.int32)
    trg_bt = trg.T.astype(jnp.int32)                                  # (B, trg_len)
    tf_flags = (jax.random.uniform(tf_key, (trg_len,))
                < teacher_forcing_ratio).astype(jnp.int32)

    # encoder input projections with b_ih + [b_hr, b_hz, 0] folded in (f32)
    enc_b = params["enc_bih"] + jnp.concatenate(
        [params["enc_bhh"][:, :2 * H], jnp.zeros((1, H), jnp.float32)], axis=1)
    src_emb = params["enc_emb"][src]                                  # (T, B, E)
    gi_enc = jnp.einsum("tbe,eg->tbg", src_emb, params["enc_wih"]) + enc_b

    # decoder gates slab: blockdiag(M1 = dec_emb @ wih_e, whh), gh lane-aligned @128
    M1 = params["dec_emb"] @ params["wih_e"]                          # (V, 3H)
    w_gates = jnp.zeros((V + H, GATE_PAD), jnp.float32)
    w_gates = w_gates.at[:V, :3 * H].set(M1)
    w_gates = w_gates.at[V:, GATE_PAD - 3 * H:].set(params["whh"])
    w_gates = w_gates.astype(jnp.bfloat16)                            # (64, 224)

    # prediction slab: vstack(M2 = dec_emb @ wo_e_pad, wo_h_pad) + wo_c_pad
    M2 = params["dec_emb"] @ _pad_cols(params["wo_e"], V_PAD)         # (V, 128)
    slab128 = jnp.concatenate(
        [M2, _pad_cols(params["wo_h"], V_PAD), _pad_cols(params["wo_c"], V_PAD)],
        axis=0).astype(jnp.bfloat16)                                  # (96, 128)

    # recurrent / context-gate weights slab
    slab96 = jnp.concatenate([params["enc_whh"], params["wih_c"]],
                             axis=0).astype(jnp.bfloat16)             # (64, 96)

    # bias slab (f32): row0 dec gi bias, row1 bo (pad lanes=-1e30), row2/3 b_hn
    dec_gi_bias = params["bih"] + jnp.concatenate(
        [params["bhh"][:, :2 * H], jnp.zeros((1, H), jnp.float32)], axis=1)
    bo_pad = jnp.concatenate(
        [params["bo"], jnp.full((1, V_PAD - V), _NEG, jnp.float32)], axis=1)
    bias_slab = jnp.zeros((8, V_PAD), jnp.float32)
    bias_slab = bias_slab.at[0, :3 * H].set(dec_gi_bias[0])
    bias_slab = bias_slab.at[1, :].set(bo_pad[0])
    bias_slab = bias_slab.at[2, :H].set(params["enc_bhh"][0, 2 * H:])
    bias_slab = bias_slab.at[3, :H].set(params["bhh"][0, 2 * H:])

    out_padded = pl.pallas_call(
        seq2seq_kernel,
        out_shape=jax.ShapeDtypeStruct((trg_len, batch, V_PAD), jnp.float32),
        in_specs=([pl.BlockSpec(memory_space=pltpu.MemorySpace.SMEM)]
                  + [pl.BlockSpec(memory_space=pltpu.MemorySpace.VMEM)] * 7),
        out_specs=pl.BlockSpec(memory_space=pltpu.MemorySpace.VMEM),
        scratch_shapes=[pltpu.VMEM((batch, 1), jnp.int32)],
    )(tf_flags, lens2d, gi_enc, trg_bt, slab96, w_gates, slab128, bias_slab)

    return out_padded[:, :, :TRG_VOCAB]


seq2seq_forward = jax.jit(_seq2seq_forward)


# --------------------------- parameter init ---------------------------------
def init_params(key):
    ks = jax.random.split(key, 16)
    s = 0.1

    def rnd(k, shape):
        return s * jax.random.normal(k, shape, dtype=jnp.float32)

    return {
        # encoder
        "enc_emb": rnd(ks[0], (SRC_VOCAB, EMB_DIM)),
        "enc_wih": rnd(ks[1], (EMB_DIM, 3 * HID_DIM)),     # W_ih^T
        "enc_whh": rnd(ks[2], (HID_DIM, 3 * HID_DIM)),     # W_hh^T
        "enc_bih": rnd(ks[3], (1, 3 * HID_DIM)),
        "enc_bhh": rnd(ks[4], (1, 3 * HID_DIM)),
        # decoder GRU  (W_ih of shape (3H, E+H) split into emb / context parts)
        "dec_emb": rnd(ks[5], (TRG_VOCAB, EMB_DIM)),
        "wih_e": rnd(ks[6], (EMB_DIM, 3 * HID_DIM)),
        "wih_c": rnd(ks[7], (HID_DIM, 3 * HID_DIM)),
        "whh": rnd(ks[8], (HID_DIM, 3 * HID_DIM)),
        "bih": rnd(ks[9], (1, 3 * HID_DIM)),
        "bhh": rnd(ks[10], (1, 3 * HID_DIM)),
        # fc_out: Linear(E + 2H -> V), weight^T split into emb / hidden / ctx
        "wo_e": rnd(ks[11], (EMB_DIM, TRG_VOCAB)),
        "wo_h": rnd(ks[12], (HID_DIM, TRG_VOCAB)),
        "wo_c": rnd(ks[13], (HID_DIM, TRG_VOCAB)),
        "bo": rnd(ks[14], (1, TRG_VOCAB)),
    }


# ------------------------------ main -----------------------------------------
if __name__ == "__main__":
    key = jax.random.PRNGKey(0)
    k_param, k_src, k_trg, k_len = jax.random.split(key, 4)

    params = init_params(k_param)

    src = jax.random.randint(k_src, (SRC_LEN, BATCH), 0, SRC_VOCAB, dtype=jnp.int32)
    trg = jax.random.randint(k_trg, (TRG_LEN, BATCH), 0, TRG_VOCAB, dtype=jnp.int32)
    src_lengths = jax.random.randint(k_len, (BATCH,), 1, SRC_LEN + 1, dtype=jnp.int32)

    outputs = seq2seq_forward(src, src_lengths, trg, params)
    outputs = jax.block_until_ready(outputs)

    assert outputs.shape == (TRG_LEN, BATCH, TRG_VOCAB)
    assert bool(jnp.all(outputs[0] == 0.0))  # outputs[0] stays zeros, as in torch
    assert bool(jnp.all(jnp.isfinite(outputs)))
    print("KERNEL_OK")
</pallas_src>

<mosaic_0001>
module attributes {stable_mosaic.version = 11 : i64} {
  func.func @seq2seq_kernel(%arg0: memref<6xi32, #tpu.memory_space<smem>>, %arg1: memref<8x1xi32, #tpu.memory_space<vmem>>, %arg2: memref<7x8x96xf32, #tpu.memory_space<vmem>>, %arg3: memref<8x6xi32, #tpu.memory_space<vmem>>, %arg4: memref<64x96xbf16, #tpu.memory_space<vmem>>, %arg5: memref<64x224xbf16, #tpu.memory_space<vmem>>, %arg6: memref<96x128xbf16, #tpu.memory_space<vmem>>, %arg7: memref<8x128xf32, #tpu.memory_space<vmem>>, %arg8: memref<6x8x128xf32, #tpu.memory_space<vmem>>, %arg9: memref<8x1xi32, #tpu.memory_space<vmem>>) attributes {dimension_semantics = [], scalar_prefetch = 0 : i64, scratch_operands = 1 : i64, tpu.core_type = #tpu.core_type<tc>} {
    %c0 = arith.constant 0 : index
    %c0_0 = arith.constant 0 : index
    %0 = vector.load %arg4[%c0, %c0_0] : memref<64x96xbf16, #tpu.memory_space<vmem>>, vector<32x96xbf16>
    %c32 = arith.constant 32 : index
    %c0_1 = arith.constant 0 : index
    %1 = vector.load %arg4[%c32, %c0_1] : memref<64x96xbf16, #tpu.memory_space<vmem>>, vector<32x96xbf16>
    %c0_2 = arith.constant 0 : index
    %c0_3 = arith.constant 0 : index
    %2 = vector.load %arg5[%c0_2, %c0_3] : memref<64x224xbf16, #tpu.memory_space<vmem>>, vector<64x224xbf16>
    %c0_4 = arith.constant 0 : index
    %c0_5 = arith.constant 0 : index
    %3 = vector.load %arg6[%c0_4, %c0_5] : memref<96x128xbf16, #tpu.memory_space<vmem>>, vector<64x128xbf16>
    %c64 = arith.constant 64 : index
    %c0_6 = arith.constant 0 : index
    %4 = vector.load %arg6[%c64, %c0_6] : memref<96x128xbf16, #tpu.memory_space<vmem>>, vector<32x128xbf16>
    %c0_7 = arith.constant 0 : index
    %c0_8 = arith.constant 0 : index
    %5 = vector.load %arg7[%c0_7, %c0_8] : memref<8x128xf32, #tpu.memory_space<vmem>>, vector<1x96xf32>
    %c1 = arith.constant 1 : index
    %c0_9 = arith.constant 0 : index
    %6 = vector.load %arg7[%c1, %c0_9] : memref<8x128xf32, #tpu.memory_space<vmem>>, vector<1x128xf32>
    %c2 = arith.constant 2 : index
    %c0_10 = arith.constant 0 : index
    %7 = vector.load %arg7[%c2, %c0_10] : memref<8x128xf32, #tpu.memory_space<vmem>>, vector<1x32xf32>
    %8 = vector.shape_cast %7 : vector<1x32xf32> to vector<1x32xf32>
    %9 = vector.broadcast %8 : vector<1x32xf32> to vector<8x32xf32>
    %c3 = arith.constant 3 : index
    %c0_11 = arith.constant 0 : index
    %10 = vector.load %arg7[%c3, %c0_11] : memref<8x128xf32, #tpu.memory_space<vmem>>, vector<1x32xf32>
    %11 = vector.shape_cast %10 : vector<1x32xf32> to vector<1x32xf32>
    %12 = vector.broadcast %11 : vector<1x32xf32> to vector<8x32xf32>
    %c0_12 = arith.constant 0 : index
    %c0_13 = arith.constant 0 : index
    %13 = vector.load %arg1[%c0_12, %c0_13] : memref<8x1xi32, #tpu.memory_space<vmem>>, vector<8x1xi32>
    %14 = vector.shape_cast %13 : vector<8x1xi32> to vector<8x1xi32>
    %15 = vector.broadcast %14 : vector<8x1xi32> to vector<8x32xi32>
    %cst = arith.constant 0.000000e+00 : f32
    %16 = vector.broadcast %cst : f32 to vector<8x32xf32>
    %c0_14 = arith.constant 0 : index
    %c0_15 = arith.constant 0 : index
    %c0_16 = arith.constant 0 : index
    %17 = vector.load %arg2[%c0_14, %c0_15, %c0_16] : memref<7x8x96xf32, #tpu.memory_space<vmem>>, vector<1x8x96xf32>
    %18 = vector.shape_cast %17 : vector<1x8x96xf32> to vector<8x96xf32>
    %19 = arith.truncf %16 : vector<8x32xf32> to vector<8x32xbf16>
    %cst_17 = arith.constant dense<0.000000e+00> : vector<8x96xf32>
    %20 = tpu.matmul %19, %0, %cst_17 {dimension_numbers = #tpu.dot_dimension_numbers<[1], [0], [0], [1], [0, 0, 1, 1], [], []>} : vector<8x32xbf16>, vector<32x96xbf16>, vector<8x96xf32> -> vector<8x96xf32>
    %21 = vector.extract_strided_slice %18 {offsets = [0, 0], sizes = [8, 64], strides = [1, 1]} : vector<8x96xf32> to vector<8x64xf32>
    %22 = vector.extract_strided_slice %20 {offsets = [0, 0], sizes = [8, 64], strides = [1, 1]} : vector<8x96xf32> to vector<8x64xf32>
    %23 = arith.addf %21, %22 : vector<8x64xf32>
    %24 = arith.negf %23 : vector<8x64xf32>
    %25 = math.exp %24 : vector<8x64xf32>
    %cst_18 = arith.constant 1.000000e+00 : f32
    %26 = vector.broadcast %cst_18 : f32 to vector<8x64xf32>
    %27 = arith.addf %26, %25 : vector<8x64xf32>
    %28 = arith.divf %26, %27 : vector<8x64xf32>
    %29 = vector.extract_strided_slice %28 {offsets = [0, 0], sizes = [8, 32], strides = [1, 1]} : vector<8x64xf32> to vector<8x32xf32>
    %30 = vector.extract_strided_slice %28 {offsets = [0, 32], sizes = [8, 32], strides = [1, 1]} : vector<8x64xf32> to vector<8x32xf32>
    %31 = vector.extract_strided_slice %18 {offsets = [0, 64], sizes = [8, 32], strides = [1, 1]} : vector<8x96xf32> to vector<8x32xf32>
    %32 = vector.extract_strided_slice %20 {offsets = [0, 64], sizes = [8, 32], strides = [1, 1]} : vector<8x96xf32> to vector<8x32xf32>
    %33 = arith.addf %32, %9 : vector<8x32xf32>
    %34 = arith.mulf %29, %33 : vector<8x32xf32>
    %35 = arith.addf %31, %34 : vector<8x32xf32>
    %36 = math.tanh %35 : vector<8x32xf32>
    %cst_19 = arith.constant 1.000000e+00 : f32
    %37 = vector.broadcast %cst_19 : f32 to vector<8x32xf32>
    %38 = arith.subf %37, %30 : vector<8x32xf32>
    %39 = arith.mulf %38, %36 : vector<8x32xf32>
    %40 = arith.mulf %30, %16 : vector<8x32xf32>
    %41 = arith.addf %39, %40 : vector<8x32xf32>
    %c0_i32 = arith.constant 0 : i32
    %42 = vector.broadcast %c0_i32 : i32 to vector<8x32xi32>
    %43 = arith.cmpi sgt, %15, %42 : vector<8x32xi32>
    %44 = arith.select %43, %41, %16 : vector<8x32xi1>, vector<8x32xf32>
    %c1_20 = arith.constant 1 : index
    %c0_21 = arith.constant 0 : index
    %c0_22 = arith.constant 0 : index
    %45 = vector.load %arg2[%c1_20, %c0_21, %c0_22] : memref<7x8x96xf32, #tpu.memory_space<vmem>>, vector<1x8x96xf32>
    %46 = vector.shape_cast %45 : vector<1x8x96xf32> to vector<8x96xf32>
    %47 = arith.truncf %44 : vector<8x32xf32> to vector<8x32xbf16>
    %cst_23 = arith.constant dense<0.000000e+00> : vector<8x96xf32>
    %48 = tpu.matmul %47, %0, %cst_23 {dimension_numbers = #tpu.dot_dimension_numbers<[1], [0], [0], [1], [0, 0, 1, 1], [], []>} : vector<8x32xbf16>, vector<32x96xbf16>, vector<8x96xf32> -> vector<8x96xf32>
    %49 = vector.extract_strided_slice %46 {offsets = [0, 0], sizes = [8, 64], strides = [1, 1]} : vector<8x96xf32> to vector<8x64xf32>
    %50 = vector.extract_strided_slice %48 {offsets = [0, 0], sizes = [8, 64], strides = [1, 1]} : vector<8x96xf32> to vector<8x64xf32>
    %51 = arith.addf %49, %50 : vector<8x64xf32>
    %52 = arith.negf %51 : vector<8x64xf32>
    %53 = math.exp %52 : vector<8x64xf32>
    %cst_24 = arith.constant 1.000000e+00 : f32
    %54 = vector.broadcast %cst_24 : f32 to vector<8x64xf32>
    %55 = arith.addf %54, %53 : vector<8x64xf32>
    %56 = arith.divf %54, %55 : vector<8x64xf32>
    %57 = vector.extract_strided_slice %56 {offsets = [0, 0], sizes = [8, 32], strides = [1, 1]} : vector<8x64xf32> to vector<8x32xf32>
    %58 = vector.extract_strided_slice %56 {offsets = [0, 32], sizes = [8, 32], strides = [1, 1]} : vector<8x64xf32> to vector<8x32xf32>
    %59 = vector.extract_strided_slice %46 {offsets = [0, 64], sizes = [8, 32], strides = [1, 1]} : vector<8x96xf32> to vector<8x32xf32>
    %60 = vector.extract_strided_slice %48 {offsets = [0, 64], sizes = [8, 32], strides = [1, 1]} : vector<8x96xf32> to vector<8x32xf32>
    %61 = arith.addf %60, %9 : vector<8x32xf32>
    %62 = arith.mulf %57, %61 : vector<8x32xf32>
    %63 = arith.addf %59, %62 : vector<8x32xf32>
    %64 = math.tanh %63 : vector<8x32xf32>
    %cst_25 = arith.constant 1.000000e+00 : f32
    %65 = vector.broadcast %cst_25 : f32 to vector<8x32xf32>
    %66 = arith.subf %65, %58 : vector<8x32xf32>
    %67 = arith.mulf %66, %64 : vector<8x32xf32>
    %68 = arith.mulf %58, %44 : vector<8x32xf32>
    %69 = arith.addf %67, %68 : vector<8x32xf32>
    %c1_i32 = arith.constant 1 : i32
    %70 = vector.broadcast %c1_i32 : i32 to vector<8x32xi32>
    %71 = arith.cmpi sgt, %15, %70 : vector<8x32xi32>
    %72 = arith.select %71, %69, %44 : vector<8x32xi1>, vector<8x32xf32>
    %c2_26 = arith.constant 2 : index
    %c0_27 = arith.constant 0 : index
    %c0_28 = arith.constant 0 : index
    %73 = vector.load %arg2[%c2_26, %c0_27, %c0_28] : memref<7x8x96xf32, #tpu.memory_space<vmem>>, vector<1x8x96xf32>
    %74 = vector.shape_cast %73 : vector<1x8x96xf32> to vector<8x96xf32>
    %75 = arith.truncf %72 : vector<8x32xf32> to vector<8x32xbf16>
    %cst_29 = arith.constant dense<0.000000e+00> : vector<8x96xf32>
    %76 = tpu.matmul %75, %0, %cst_29 {dimension_numbers = #tpu.dot_dimension_numbers<[1], [0], [0], [1], [0, 0, 1, 1], [], []>} : vector<8x32xbf16>, vector<32x96xbf16>, vector<8x96xf32> -> vector<8x96xf32>
    %77 = vector.extract_strided_slice %74 {offsets = [0, 0], sizes = [8, 64], strides = [1, 1]} : vector<8x96xf32> to vector<8x64xf32>
    %78 = vector.extract_strided_slice %76 {offsets = [0, 0], sizes = [8, 64], strides = [1, 1]} : vector<8x96xf32> to vector<8x64xf32>
    %79 = arith.addf %77, %78 : vector<8x64xf32>
    %80 = arith.negf %79 : vector<8x64xf32>
    %81 = math.exp %80 : vector<8x64xf32>
    %cst_30 = arith.constant 1.000000e+00 : f32
    %82 = vector.broadcast %cst_30 : f32 to vector<8x64xf32>
    %83 = arith.addf %82, %81 : vector<8x64xf32>
    %84 = arith.divf %82, %83 : vector<8x64xf32>
    %85 = vector.extract_strided_slice %84 {offsets = [0, 0], sizes = [8, 32], strides = [1, 1]} : vector<8x64xf32> to vector<8x32xf32>
    %86 = vector.extract_strided_slice %84 {offsets = [0, 32], sizes = [8, 32], strides = [1, 1]} : vector<8x64xf32> to vector<8x32xf32>
    %87 = vector.extract_strided_slice %74 {offsets = [0, 64], sizes = [8, 32], strides = [1, 1]} : vector<8x96xf32> to vector<8x32xf32>
    %88 = vector.extract_strided_slice %76 {offsets = [0, 64], sizes = [8, 32], strides = [1, 1]} : vector<8x96xf32> to vector<8x32xf32>
    %89 = arith.addf %88, %9 : vector<8x32xf32>
    %90 = arith.mulf %85, %89 : vector<8x32xf32>
    %91 = arith.addf %87, %90 : vector<8x32xf32>
    %92 = math.tanh %91 : vector<8x32xf32>
    %cst_31 = arith.constant 1.000000e+00 : f32
    %93 = vector.broadcast %cst_31 : f32 to vector<8x32xf32>
    %94 = arith.subf %93, %86 : vector<8x32xf32>
    %95 = arith.mulf %94, %92 : vector<8x32xf32>
    %96 = arith.mulf %86, %72 : vector<8x32xf32>
    %97 = arith.addf %95, %96 : vector<8x32xf32>
    %c2_i32 = arith.constant 2 : i32
    %98 = vector.broadcast %c2_i32 : i32 to vector<8x32xi32>
    %99 = arith.cmpi sgt, %15, %98 : vector<8x32xi32>
    %100 = arith.select %99, %97, %72 : vector<8x32xi1>, vector<8x32xf32>
    %c3_32 = arith.constant 3 : index
    %c0_33 = arith.constant 0 : index
    %c0_34 = arith.constant 0 : index
    %101 = vector.load %arg2[%c3_32, %c0_33, %c0_34] : memref<7x8x96xf32, #tpu.memory_space<vmem>>, vector<1x8x96xf32>
    %102 = vector.shape_cast %101 : vector<1x8x96xf32> to vector<8x96xf32>
    %103 = arith.truncf %100 : vector<8x32xf32> to vector<8x32xbf16>
    %cst_35 = arith.constant dense<0.000000e+00> : vector<8x96xf32>
    %104 = tpu.matmul %103, %0, %cst_35 {dimension_numbers = #tpu.dot_dimension_numbers<[1], [0], [0], [1], [0, 0, 1, 1], [], []>} : vector<8x32xbf16>, vector<32x96xbf16>, vector<8x96xf32> -> vector<8x96xf32>
    %105 = vector.extract_strided_slice %102 {offsets = [0, 0], sizes = [8, 64], strides = [1, 1]} : vector<8x96xf32> to vector<8x64xf32>
    %106 = vector.extract_strided_slice %104 {offsets = [0, 0], sizes = [8, 64], strides = [1, 1]} : vector<8x96xf32> to vector<8x64xf32>
    %107 = arith.addf %105, %106 : vector<8x64xf32>
    %108 = arith.negf %107 : vector<8x64xf32>
    %109 = math.exp %108 : vector<8x64xf32>
    %cst_36 = arith.constant 1.000000e+00 : f32
    %110 = vector.broadcast %cst_36 : f32 to vector<8x64xf32>
    %111 = arith.addf %110, %109 : vector<8x64xf32>
    %112 = arith.divf %110, %111 : vector<8x64xf32>
    %113 = vector.extract_strided_slice %112 {offsets = [0, 0], sizes = [8, 32], strides = [1, 1]} : vector<8x64xf32> to vector<8x32xf32>
    %114 = vector.extract_strided_slice %112 {offsets = [0, 32], sizes = [8, 32], strides = [1, 1]} : vector<8x64xf32> to vector<8x32xf32>
    %115 = vector.extract_strided_slice %102 {offsets = [0, 64], sizes = [8, 32], strides = [1, 1]} : vector<8x96xf32> to vector<8x32xf32>
    %116 = vector.extract_strided_slice %104 {offsets = [0, 64], sizes = [8, 32], strides = [1, 1]} : vector<8x96xf32> to vector<8x32xf32>
    %117 = arith.addf %116, %9 : vector<8x32xf32>
    %118 = arith.mulf %113, %117 : vector<8x32xf32>
    %119 = arith.addf %115, %118 : vector<8x32xf32>
    %120 = math.tanh %119 : vector<8x32xf32>
    %cst_37 = arith.constant 1.000000e+00 : f32
    %121 = vector.broadcast %cst_37 : f32 to vector<8x32xf32>
    %122 = arith.subf %121, %114 : vector<8x32xf32>
    %123 = arith.mulf %122, %120 : vector<8x32xf32>
    %124 = arith.mulf %114, %100 : vector<8x32xf32>
    %125 = arith.addf %123, %124 : vector<8x32xf32>
    %c3_i32 = arith.constant 3 : i32
    %126 = vector.broadcast %c3_i32 : i32 to vector<8x32xi32>
    %127 = arith.cmpi sgt, %15, %126 : vector<8x32xi32>
    %128 = arith.select %127, %125, %100 : vector<8x32xi1>, vector<8x32xf32>
    %c4 = arith.constant 4 : index
    %c0_38 = arith.constant 0 : index
    %c0_39 = arith.constant 0 : index
    %129 = vector.load %arg2[%c4, %c0_38, %c0_39] : memref<7x8x96xf32, #tpu.memory_space<vmem>>, vector<1x8x96xf32>
    %130 = vector.shape_cast %129 : vector<1x8x96xf32> to vector<8x96xf32>
    %131 = arith.truncf %128 : vector<8x32xf32> to vector<8x32xbf16>
    %cst_40 = arith.constant dense<0.000000e+00> : vector<8x96xf32>
    %132 = tpu.matmul %131, %0, %cst_40 {dimension_numbers = #tpu.dot_dimension_numbers<[1], [0], [0], [1], [0, 0, 1, 1], [], []>} : vector<8x32xbf16>, vector<32x96xbf16>, vector<8x96xf32> -> vector<8x96xf32>
    %133 = vector.extract_strided_slice %130 {offsets = [0, 0], sizes = [8, 64], strides = [1, 1]} : vector<8x96xf32> to vector<8x64xf32>
    %134 = vector.extract_strided_slice %132 {offsets = [0, 0], sizes = [8, 64], strides = [1, 1]} : vector<8x96xf32> to vector<8x64xf32>
    %135 = arith.addf %133, %134 : vector<8x64xf32>
    %136 = arith.negf %135 : vector<8x64xf32>
    %137 = math.exp %136 : vector<8x64xf32>
    %cst_41 = arith.constant 1.000000e+00 : f32
    %138 = vector.broadcast %cst_41 : f32 to vector<8x64xf32>
    %139 = arith.addf %138, %137 : vector<8x64xf32>
    %140 = arith.divf %138, %139 : vector<8x64xf32>
    %141 = vector.extract_strided_slice %140 {offsets = [0, 0], sizes = [8, 32], strides = [1, 1]} : vector<8x64xf32> to vector<8x32xf32>
    %142 = vector.extract_strided_slice %140 {offsets = [0, 32], sizes = [8, 32], strides = [1, 1]} : vector<8x64xf32> to vector<8x32xf32>
    %143 = vector.extract_strided_slice %130 {offsets = [0, 64], sizes = [8, 32], strides = [1, 1]} : vector<8x96xf32> to vector<8x32xf32>
    %144 = vector.extract_strided_slice %132 {offsets = [0, 64], sizes = [8, 32], strides = [1, 1]} : vector<8x96xf32> to vector<8x32xf32>
    %145 = arith.addf %144, %9 : vector<8x32xf32>
    %146 = arith.mulf %141, %145 : vector<8x32xf32>
    %147 = arith.addf %143, %146 : vector<8x32xf32>
    %148 = math.tanh %147 : vector<8x32xf32>
    %cst_42 = arith.constant 1.000000e+00 : f32
    %149 = vector.broadcast %cst_42 : f32 to vector<8x32xf32>
    %150 = arith.subf %149, %142 : vector<8x32xf32>
    %151 = arith.mulf %150, %148 : vector<8x32xf32>
    %152 = arith.mulf %142, %128 : vector<8x32xf32>
    %153 = arith.addf %151, %152 : vector<8x32xf32>
    %c4_i32 = arith.constant 4 : i32
    %154 = vector.broadcast %c4_i32 : i32 to vector<8x32xi32>
    %155 = arith.cmpi sgt, %15, %154 : vector<8x32xi32>
    %156 = arith.select %155, %153, %128 : vector<8x32xi1>, vector<8x32xf32>
    %c5 = arith.constant 5 : index
    %c0_43 = arith.constant 0 : index
    %c0_44 = arith.constant 0 : index
    %157 = vector.load %arg2[%c5, %c0_43, %c0_44] : memref<7x8x96xf32, #tpu.memory_space<vmem>>, vector<1x8x96xf32>
    %158 = vector.shape_cast %157 : vector<1x8x96xf32> to vector<8x96xf32>
    %159 = arith.truncf %156 : vector<8x32xf32> to vector<8x32xbf16>
    %cst_45 = arith.constant dense<0.000000e+00> : vector<8x96xf32>
    %160 = tpu.matmul %159, %0, %cst_45 {dimension_numbers = #tpu.dot_dimension_numbers<[1], [0], [0], [1], [0, 0, 1, 1], [], []>} : vector<8x32xbf16>, vector<32x96xbf16>, vector<8x96xf32> -> vector<8x96xf32>
    %161 = vector.extract_strided_slice %158 {offsets = [0, 0], sizes = [8, 64], strides = [1, 1]} : vector<8x96xf32> to vector<8x64xf32>
    %162 = vector.extract_strided_slice %160 {offsets = [0, 0], sizes = [8, 64], strides = [1, 1]} : vector<8x96xf32> to vector<8x64xf32>
    %163 = arith.addf %161, %162 : vector<8x64xf32>
    %164 = arith.negf %163 : vector<8x64xf32>
    %165 = math.exp %164 : vector<8x64xf32>
    %cst_46 = arith.constant 1.000000e+00 : f32
    %166 = vector.broadcast %cst_46 : f32 to vector<8x64xf32>
    %167 = arith.addf %166, %165 : vector<8x64xf32>
    %168 = arith.divf %166, %167 : vector<8x64xf32>
    %169 = vector.extract_strided_slice %168 {offsets = [0, 0], sizes = [8, 32], strides = [1, 1]} : vector<8x64xf32> to vector<8x32xf32>
    %170 = vector.extract_strided_slice %168 {offsets = [0, 32], sizes = [8, 32], strides = [1, 1]} : vector<8x64xf32> to vector<8x32xf32>
    %171 = vector.extract_strided_slice %158 {offsets = [0, 64], sizes = [8, 32], strides = [1, 1]} : vector<8x96xf32> to vector<8x32xf32>
    %172 = vector.extract_strided_slice %160 {offsets = [0, 64], sizes = [8, 32], strides = [1, 1]} : vector<8x96xf32> to vector<8x32xf32>
    %173 = arith.addf %172, %9 : vector<8x32xf32>
    %174 = arith.mulf %169, %173 : vector<8x32xf32>
    %175 = arith.addf %171, %174 : vector<8x32xf32>
    %176 = math.tanh %175 : vector<8x32xf32>
    %cst_47 = arith.constant 1.000000e+00 : f32
    %177 = vector.broadcast %cst_47 : f32 to vector<8x32xf32>
    %178 = arith.subf %177, %170 : vector<8x32xf32>
    %179 = arith.mulf %178, %176 : vector<8x32xf32>
    %180 = arith.mulf %170, %156 : vector<8x32xf32>
    %181 = arith.addf %179, %180 : vector<8x32xf32>
    %c5_i32 = arith.constant 5 : i32
    %182 = vector.broadcast %c5_i32 : i32 to vector<8x32xi32>
    %183 = arith.cmpi sgt, %15, %182 : vector<8x32xi32>
    %184 = arith.select %183, %181, %156 : vector<8x32xi1>, vector<8x32xf32>
    %c6 = arith.constant 6 : index
    %c0_48 = arith.constant 0 : index
    %c0_49 = arith.constant 0 : index
    %185 = vector.load %arg2[%c6, %c0_48, %c0_49] : memref<7x8x96xf32, #tpu.memory_space<vmem>>, vector<1x8x96xf32>
    %186 = vector.shape_cast %185 : vector<1x8x96xf32> to vector<8x96xf32>
    %187 = arith.truncf %184 : vector<8x32xf32> to vector<8x32xbf16>
    %cst_50 = arith.constant dense<0.000000e+00> : vector<8x96xf32>
    %188 = tpu.matmul %187, %0, %cst_50 {dimension_numbers = #tpu.dot_dimension_numbers<[1], [0], [0], [1], [0, 0, 1, 1], [], []>} : vector<8x32xbf16>, vector<32x96xbf16>, vector<8x96xf32> -> vector<8x96xf32>
    %189 = vector.extract_strided_slice %186 {offsets = [0, 0], sizes = [8, 64], strides = [1, 1]} : vector<8x96xf32> to vector<8x64xf32>
    %190 = vector.extract_strided_slice %188 {offsets = [0, 0], sizes = [8, 64], strides = [1, 1]} : vector<8x96xf32> to vector<8x64xf32>
    %191 = arith.addf %189, %190 : vector<8x64xf32>
    %192 = arith.negf %191 : vector<8x64xf32>
    %193 = math.exp %192 : vector<8x64xf32>
    %cst_51 = arith.constant 1.000000e+00 : f32
    %194 = vector.broadcast %cst_51 : f32 to vector<8x64xf32>
    %195 = arith.addf %194, %193 : vector<8x64xf32>
    %196 = arith.divf %194, %195 : vector<8x64xf32>
    %197 = vector.extract_strided_slice %196 {offsets = [0, 0], sizes = [8, 32], strides = [1, 1]} : vector<8x64xf32> to vector<8x32xf32>
    %198 = vector.extract_strided_slice %196 {offsets = [0, 32], sizes = [8, 32], strides = [1, 1]} : vector<8x64xf32> to vector<8x32xf32>
    %199 = vector.extract_strided_slice %186 {offsets = [0, 64], sizes = [8, 32], strides = [1, 1]} : vector<8x96xf32> to vector<8x32xf32>
    %200 = vector.extract_strided_slice %188 {offsets = [0, 64], sizes = [8, 32], strides = [1, 1]} : vector<8x96xf32> to vector<8x32xf32>
    %201 = arith.addf %200, %9 : vector<8x32xf32>
    %202 = arith.mulf %197, %201 : vector<8x32xf32>
    %203 = arith.addf %199, %202 : vector<8x32xf32>
    %204 = math.tanh %203 : vector<8x32xf32>
    %cst_52 = arith.constant 1.000000e+00 : f32
    %205 = vector.broadcast %cst_52 : f32 to vector<8x32xf32>
    %206 = arith.subf %205, %198 : vector<8x32xf32>
    %207 = arith.mulf %206, %204 : vector<8x32xf32>
    %208 = arith.mulf %198, %184 : vector<8x32xf32>
    %209 = arith.addf %207, %208 : vector<8x32xf32>
    %c6_i32 = arith.constant 6 : i32
    %210 = vector.broadcast %c6_i32 : i32 to vector<8x32xi32>
    %211 = arith.cmpi sgt, %15, %210 : vector<8x32xi32>
    %212 = arith.select %211, %209, %184 : vector<8x32xi1>, vector<8x32xf32>
    %213 = arith.truncf %212 : vector<8x32xf32> to vector<8x32xbf16>
    %cst_53 = arith.constant dense<0.000000e+00> : vector<8x96xf32>
    %214 = tpu.matmul %213, %1, %cst_53 {dimension_numbers = #tpu.dot_dimension_numbers<[1], [0], [0], [1], [0, 0, 1, 1], [], []>} : vector<8x32xbf16>, vector<32x96xbf16>, vector<8x96xf32> -> vector<8x96xf32>
    %215 = vector.broadcast %5 : vector<1x96xf32> to vector<8x96xf32>
    %216 = arith.addf %214, %215 : vector<8x96xf32>
    %cst_54 = arith.constant dense<0.000000e+00> : vector<8x128xf32>
    %217 = tpu.matmul %213, %4, %cst_54 {dimension_numbers = #tpu.dot_dimension_numbers<[1], [0], [0], [1], [0, 0, 1, 1], [], []>} : vector<8x32xbf16>, vector<32x128xbf16>, vector<8x128xf32> -> vector<8x128xf32>
    %218 = vector.broadcast %6 : vector<1x128xf32> to vector<8x128xf32>
    %219 = arith.addf %217, %218 : vector<8x128xf32>
    %220 = tpu.iota {dimensions = array<i32: 1>} : vector<8x32xi32>
    %221 = tpu.iota {dimensions = array<i32: 1>} : vector<8x128xi32>
    %cst_55 = arith.constant 0.000000e+00 : f32
    %222 = vector.broadcast %cst_55 : f32 to vector<8x128xf32>
    %c0_56 = arith.constant 0 : index
    %c0_57 = arith.constant 0 : index
    %c0_58 = arith.constant 0 : index
    %223 = vector.load %arg8[%c0_56, %c0_57, %c0_58] : memref<6x8x128xf32, #tpu.memory_space<vmem>>, vector<1x8x128xf32>
    %224 = vector.shape_cast %223 : vector<1x8x128xf32> to vector<8x128xf32>
    %225 = vector.shape_cast %222 : vector<8x128xf32> to vector<1x8x128xf32>
    tpu.vector_store %arg8[%c0_56, %c0_57, %c0_58], %225 {strides = array<i32>} : memref<6x8x128xf32, #tpu.memory_space<vmem>>, vector<1x8x128xf32>,
    %c0_59 = arith.constant 0 : index
    %c0_60 = arith.constant 0 : index
    %226 = vector.load %arg3[%c0_59, %c0_60] : memref<8x6xi32, #tpu.memory_space<vmem>>, vector<8x1xi32>
    %c0_61 = arith.constant 0 : index
    %c0_62 = arith.constant 0 : index
    %227 = vector.load %arg9[%c0_61, %c0_62] : memref<8x1xi32, #tpu.memory_space<vmem>>, vector<8x1xi32>
    tpu.vector_store %arg9[%c0_61, %c0_62], %226 {strides = array<i32>} : memref<8x1xi32, #tpu.memory_space<vmem>>, vector<8x1xi32>,
    %c0_63 = arith.constant 0 : index
    %c0_64 = arith.constant 0 : index
    %228 = vector.load %arg9[%c0_63, %c0_64] : memref<8x1xi32, #tpu.memory_space<vmem>>, vector<8x1xi32>
    %229 = vector.broadcast %228 : vector<8x1xi32> to vector<8x32xi32>
    %230 = arith.cmpi eq, %229, %220 : vector<8x32xi32>
    %231 = arith.extui %230 : vector<8x32xi1> to vector<8x32xi32>
    %232 = arith.sitofp %231 : vector<8x32xi32> to vector<8x32xf32>
    %233 = tpu.concatenate %232, %212 in 1 : vector<8x32xf32>, vector<8x32xf32> -> vector<8x64xf32>
    %234 = arith.truncf %233 : vector<8x64xf32> to vector<8x64xbf16>
    %cst_65 = arith.constant dense<0.000000e+00> : vector<8x224xf32>
    %235 = tpu.matmul %234, %2, %cst_65 {dimension_numbers = #tpu.dot_dimension_numbers<[1], [0], [0], [1], [0, 0, 1, 1], [], []>} : vector<8x64xbf16>, vector<64x224xbf16>, vector<8x224xf32> -> vector<8x224xf32>
    %236 = vector.extract_strided_slice %235 {offsets = [0, 0], sizes = [8, 96], strides = [1, 1]} : vector<8x224xf32> to vector<8x96xf32>
    %237 = arith.addf %236, %216 : vector<8x96xf32>
    %238 = vector.extract_strided_slice %235 {offsets = [0, 128], sizes = [8, 96], strides = [1, 1]} : vector<8x224xf32> to vector<8x96xf32>
    %239 = vector.extract_strided_slice %237 {offsets = [0, 0], sizes = [8, 64], strides = [1, 1]} : vector<8x96xf32> to vector<8x64xf32>
    %240 = vector.extract_strided_slice %238 {offsets = [0, 0], sizes = [8, 64], strides = [1, 1]} : vector<8x96xf32> to vector<8x64xf32>
    %241 = arith.addf %239, %240 : vector<8x64xf32>
    %242 = arith.negf %241 : vector<8x64xf32>
    %243 = math.exp %242 : vector<8x64xf32>
    %cst_66 = arith.constant 1.000000e+00 : f32
    %244 = vector.broadcast %cst_66 : f32 to vector<8x64xf32>
    %245 = arith.addf %244, %243 : vector<8x64xf32>
    %246 = arith.divf %244, %245 : vector<8x64xf32>
    %247 = vector.extract_strided_slice %246 {offsets = [0, 0], sizes = [8, 32], strides = [1, 1]} : vector<8x64xf32> to vector<8x32xf32>
    %248 = vector.extract_strided_slice %246 {offsets = [0, 32], sizes = [8, 32], strides = [1, 1]} : vector<8x64xf32> to vector<8x32xf32>
    %249 = vector.extract_strided_slice %237 {offsets = [0, 64], sizes = [8, 32], strides = [1, 1]} : vector<8x96xf32> to vector<8x32xf32>
    %250 = vector.extract_strided_slice %238 {offsets = [0, 64], sizes = [8, 32], strides = [1, 1]} : vector<8x96xf32> to vector<8x32xf32>
    %251 = arith.addf %250, %12 : vector<8x32xf32>
    %252 = arith.mulf %247, %251 : vector<8x32xf32>
    %253 = arith.addf %249, %252 : vector<8x32xf32>
    %254 = math.tanh %253 : vector<8x32xf32>
    %cst_67 = arith.constant 1.000000e+00 : f32
    %255 = vector.broadcast %cst_67 : f32 to vector<8x32xf32>
    %256 = arith.subf %255, %248 : vector<8x32xf32>
    %257 = arith.mulf %256, %254 : vector<8x32xf32>
    %258 = arith.mulf %248, %212 : vector<8x32xf32>
    %259 = arith.addf %257, %258 : vector<8x32xf32>
    %260 = tpu.concatenate %232, %259 in 1 : vector<8x32xf32>, vector<8x32xf32> -> vector<8x64xf32>
    %261 = arith.truncf %260 : vector<8x64xf32> to vector<8x64xbf16>
    %cst_68 = arith.constant dense<0.000000e+00> : vector<8x128xf32>
    %262 = tpu.matmul %261, %3, %cst_68 {dimension_numbers = #tpu.dot_dimension_numbers<[1], [0], [0], [1], [0, 0, 1, 1], [], []>} : vector<8x64xbf16>, vector<64x128xbf16>, vector<8x128xf32> -> vector<8x128xf32>
    %263 = arith.addf %262, %219 : vector<8x128xf32>
    %c1_69 = arith.constant 1 : index
    %c0_70 = arith.constant 0 : index
    %c0_71 = arith.constant 0 : index
    %264 = vector.load %arg8[%c1_69, %c0_70, %c0_71] : memref<6x8x128xf32, #tpu.memory_space<vmem>>, vector<1x8x128xf32>
    %265 = vector.shape_cast %264 : vector<1x8x128xf32> to vector<8x128xf32>
    %266 = vector.shape_cast %263 : vector<8x128xf32> to vector<1x8x128xf32>
    tpu.vector_store %arg8[%c1_69, %c0_70, %c0_71], %266 {strides = array<i32>} : memref<6x8x128xf32, #tpu.memory_space<vmem>>, vector<1x8x128xf32>,
    %c1_72 = arith.constant 1 : index
    %267 = memref.load %arg0[%c1_72] : memref<6xi32, #tpu.memory_space<smem>>
    %c0_i32_73 = arith.constant 0 : i32
    %268 = arith.cmpi ne, %267, %c0_i32_73 : i32
    %269 = arith.extui %268 : i1 to i32
    %c0_i32_74 = arith.constant 0 : i32
    %270 = arith.cmpi ne, %269, %c0_i32_74 : i32
    scf.if %270 {
      %c0_128 = arith.constant 0 : index
      %c1_129 = arith.constant 1 : index
      %451 = vector.load %arg3[%c0_128, %c1_129] : memref<8x6xi32, #tpu.memory_space<vmem>>, vector<8x1xi32>
      %c0_130 = arith.constant 0 : index
      %c0_131 = arith.constant 0 : index
      %452 = vector.load %arg9[%c0_130, %c0_131] : memref<8x1xi32, #tpu.memory_space<vmem>>, vector<8x1xi32>
      tpu.vector_store %arg9[%c0_130, %c0_131], %451 {strides = array<i32>} : memref<8x1xi32, #tpu.memory_space<vmem>>, vector<8x1xi32>,
    } else {
    }
    %c0_i32_75 = arith.constant 0 : i32
    %271 = arith.cmpi eq, %267, %c0_i32_75 : i32
    %272 = arith.extui %271 : i1 to i32
    %c0_i32_76 = arith.constant 0 : i32
    %273 = arith.cmpi ne, %272, %c0_i32_76 : i32
    scf.if %273 {
      %cst_128 = arith.constant dense<0xFF800000> : vector<8xf32>
      %451 = vector.multi_reduction <maximumf>, %263, %cst_128 [1] : vector<8x128xf32> to vector<8xf32>
      %452 = vector.shape_cast %451 : vector<8xf32> to vector<8x1xf32>
      %453 = vector.broadcast %452 : vector<8x1xf32> to vector<8x128xf32>
      %454 = arith.cmpf oeq, %263, %453 : vector<8x128xf32>
      %c128_i32 = arith.constant 128 : i32
      %455 = vector.broadcast %c128_i32 : i32 to vector<8x128xi32>
      %456 = arith.select %454, %221, %455 : vector<8x128xi1>, vector<8x128xi32>
      %cst_129 = arith.constant dense<2147483647> : vector<8xi32>
      %457 = vector.multi_reduction <minsi>, %456, %cst_129 [1] : vector<8x128xi32> to vector<8xi32>
      %458 = vector.shape_cast %457 : vector<8xi32> to vector<8x1xi32>
      %c0_130 = arith.constant 0 : index
      %c0_131 = arith.constant 0 : index
      %459 = vector.load %arg9[%c0_130, %c0_131] : memref<8x1xi32, #tpu.memory_space<vmem>>, vector<8x1xi32>
      tpu.vector_store %arg9[%c0_130, %c0_131], %458 {strides = array<i32>} : memref<8x1xi32, #tpu.memory_space<vmem>>, vector<8x1xi32>,
    } else {
    }
    %c0_77 = arith.constant 0 : index
    %c0_78 = arith.constant 0 : index
    %274 = vector.load %arg9[%c0_77, %c0_78] : memref<8x1xi32, #tpu.memory_space<vmem>>, vector<8x1xi32>
    %275 = vector.broadcast %274 : vector<8x1xi32> to vector<8x32xi32>
    %276 = arith.cmpi eq, %275, %220 : vector<8x32xi32>
    %277 = arith.extui %276 : vector<8x32xi1> to vector<8x32xi32>
    %278 = arith.sitofp %277 : vector<8x32xi32> to vector<8x32xf32>
    %279 = tpu.concatenate %278, %259 in 1 : vector<8x32xf32>, vector<8x32xf32> -> vector<8x64xf32>
    %280 = arith.truncf %279 : vector<8x64xf32> to vector<8x64xbf16>
    %cst_79 = arith.constant dense<0.000000e+00> : vector<8x224xf32>
    %281 = tpu.matmul %280, %2, %cst_79 {dimension_numbers = #tpu.dot_dimension_numbers<[1], [0], [0], [1], [0, 0, 1, 1], [], []>} : vector<8x64xbf16>, vector<64x224xbf16>, vector<8x224xf32> -> vector<8x224xf32>
    %282 = vector.extract_strided_slice %281 {offsets = [0, 0], sizes = [8, 96], strides = [1, 1]} : vector<8x224xf32> to vector<8x96xf32>
    %283 = arith.addf %282, %216 : vector<8x96xf32>
    %284 = vector.extract_strided_slice %281 {offsets = [0, 128], sizes = [8, 96], strides = [1, 1]} : vector<8x224xf32> to vector<8x96xf32>
    %285 = vector.extract_strided_slice %283 {offsets = [0, 0], sizes = [8, 64], strides = [1, 1]} : vector<8x96xf32> to vector<8x64xf32>
    %286 = vector.extract_strided_slice %284 {offsets = [0, 0], sizes = [8, 64], strides = [1, 1]} : vector<8x96xf32> to vector<8x64xf32>
    %287 = arith.addf %285, %286 : vector<8x64xf32>
    %288 = arith.negf %287 : vector<8x64xf32>
    %289 = math.exp %288 : vector<8x64xf32>
    %cst_80 = arith.constant 1.000000e+00 : f32
    %290 = vector.broadcast %cst_80 : f32 to vector<8x64xf32>
    %291 = arith.addf %290, %289 : vector<8x64xf32>
    %292 = arith.divf %290, %291 : vector<8x64xf32>
    %293 = vector.extract_strided_slice %292 {offsets = [0, 0], sizes = [8, 32], strides = [1, 1]} : vector<8x64xf32> to vector<8x32xf32>
    %294 = vector.extract_strided_slice %292 {offsets = [0, 32], sizes = [8, 32], strides = [1, 1]} : vector<8x64xf32> to vector<8x32xf32>
    %295 = vector.extract_strided_slice %283 {offsets = [0, 64], sizes = [8, 32], strides = [1, 1]} : vector<8x96xf32> to vector<8x32xf32>
    %296 = vector.extract_strided_slice %284 {offsets = [0, 64], sizes = [8, 32], strides = [1, 1]} : vector<8x96xf32> to vector<8x32xf32>
    %297 = arith.addf %296, %12 : vector<8x32xf32>
    %298 = arith.mulf %293, %297 : vector<8x32xf32>
    %299 = arith.addf %295, %298 : vector<8x32xf32>
    %300 = math.tanh %299 : vector<8x32xf32>
    %cst_81 = arith.constant 1.000000e+00 : f32
    %301 = vector.broadcast %cst_81 : f32 to vector<8x32xf32>
    %302 = arith.subf %301, %294 : vector<8x32xf32>
    %303 = arith.mulf %302, %300 : vector<8x32xf32>
    %304 = arith.mulf %294, %259 : vector<8x32xf32>
    %305 = arith.addf %303, %304 : vector<8x32xf32>
    %306 = tpu.concatenate %278, %305 in 1 : vector<8x32xf32>, vector<8x32xf32> -> vector<8x64xf32>
    %307 = arith.truncf %306 : vector<8x64xf32> to vector<8x64xbf16>
    %cst_82 = arith.constant dense<0.000000e+00> : vector<8x128xf32>
    %308 = tpu.matmul %307, %3, %cst_82 {dimension_numbers = #tpu.dot_dimension_numbers<[1], [0], [0], [1], [0, 0, 1, 1], [], []>} : vector<8x64xbf16>, vector<64x128xbf16>, vector<8x128xf32> -> vector<8x128xf32>
    %309 = arith.addf %308, %219 : vector<8x128xf32>
    %c2_83 = arith.constant 2 : index
    %c0_84 = arith.constant 0 : index
    %c0_85 = arith.constant 0 : index
    %310 = vector.load %arg8[%c2_83, %c0_84, %c0_85] : memref<6x8x128xf32, #tpu.memory_space<vmem>>, vector<1x8x128xf32>
    %311 = vector.shape_cast %310 : vector<1x8x128xf32> to vector<8x128xf32>
    %312 = vector.shape_cast %309 : vector<8x128xf32> to vector<1x8x128xf32>
    tpu.vector_store %arg8[%c2_83, %c0_84, %c0_85], %312 {strides = array<i32>} : memref<6x8x128xf32, #tpu.memory_space<vmem>>, vector<1x8x128xf32>,
    %c2_86 = arith.constant 2 : index
    %313 = memref.load %arg0[%c2_86] : memref<6xi32, #tpu.memory_space<smem>>
    %c0_i32_87 = arith.constant 0 : i32
    %314 = arith.cmpi ne, %313, %c0_i32_87 : i32
    %315 = arith.extui %314 : i1 to i32
    %c0_i32_88 = arith.constant 0 : i32
    %316 = arith.cmpi ne, %315, %c0_i32_88 : i32
    scf.if %316 {
      %c0_128 = arith.constant 0 : index
      %c2_129 = arith.constant 2 : index
      %451 = vector.load %arg3[%c0_128, %c2_129] : memref<8x6xi32, #tpu.memory_space<vmem>>, vector<8x1xi32>
      %c0_130 = arith.constant 0 : index
      %c0_131 = arith.constant 0 : index
      %452 = vector.load %arg9[%c0_130, %c0_131] : memref<8x1xi32, #tpu.memory_space<vmem>>, vector<8x1xi32>
      tpu.vector_store %arg9[%c0_130, %c0_131], %451 {strides = array<i32>} : memref<8x1xi32, #tpu.memory_space<vmem>>, vector<8x1xi32>,
    } else {
    }
    %c0_i32_89 = arith.constant 0 : i32
    %317 = arith.cmpi eq, %313, %c0_i32_89 : i32
    %318 = arith.extui %317 : i1 to i32
    %c0_i32_90 = arith.constant 0 : i32
    %319 = arith.cmpi ne, %318, %c0_i32_90 : i32
    scf.if %319 {
      %cst_128 = arith.constant dense<0xFF800000> : vector<8xf32>
      %451 = vector.multi_reduction <maximumf>, %309, %cst_128 [1] : vector<8x128xf32> to vector<8xf32>
      %452 = vector.shape_cast %451 : vector<8xf32> to vector<8x1xf32>
      %453 = vector.broadcast %452 : vector<8x1xf32> to vector<8x128xf32>
      %454 = arith.cmpf oeq, %309, %453 : vector<8x128xf32>
      %c128_i32 = arith.constant 128 : i32
      %455 = vector.broadcast %c128_i32 : i32 to vector<8x128xi32>
      %456 = arith.select %454, %221, %455 : vector<8x128xi1>, vector<8x128xi32>
      %cst_129 = arith.constant dense<2147483647> : vector<8xi32>
      %457 = vector.multi_reduction <minsi>, %456, %cst_129 [1] : vector<8x128xi32> to vector<8xi32>
      %458 = vector.shape_cast %457 : vector<8xi32> to vector<8x1xi32>
      %c0_130 = arith.constant 0 : index
      %c0_131 = arith.constant 0 : index
      %459 = vector.load %arg9[%c0_130, %c0_131] : memref<8x1xi32, #tpu.memory_space<vmem>>, vector<8x1xi32>
      tpu.vector_store %arg9[%c0_130, %c0_131], %458 {strides = array<i32>} : memref<8x1xi32, #tpu.memory_space<vmem>>, vector<8x1xi32>,
    } else {
    }
    %c0_91 = arith.constant 0 : index
    %c0_92 = arith.constant 0 : index
    %320 = vector.load %arg9[%c0_91, %c0_92] : memref<8x1xi32, #tpu.memory_space<vmem>>, vector<8x1xi32>
    %321 = vector.broadcast %320 : vector<8x1xi32> to vector<8x32xi32>
    %322 = arith.cmpi eq, %321, %220 : vector<8x32xi32>
    %323 = arith.extui %322 : vector<8x32xi1> to vector<8x32xi32>
    %324 = arith.sitofp %323 : vector<8x32xi32> to vector<8x32xf32>
    %325 = tpu.concatenate %324, %305 in 1 : vector<8x32xf32>, vector<8x32xf32> -> vector<8x64xf32>
    %326 = arith.truncf %325 : vector<8x64xf32> to vector<8x64xbf16>
    %cst_93 = arith.constant dense<0.000000e+00> : vector<8x224xf32>
    %327 = tpu.matmul %326, %2, %cst_93 {dimension_numbers = #tpu.dot_dimension_numbers<[1], [0], [0], [1], [0, 0, 1, 1], [], []>} : vector<8x64xbf16>, vector<64x224xbf16>, vector<8x224xf32> -> vector<8x224xf32>
    %328 = vector.extract_strided_slice %327 {offsets = [0, 0], sizes = [8, 96], strides = [1, 1]} : vector<8x224xf32> to vector<8x96xf32>
    %329 = arith.addf %328, %216 : vector<8x96xf32>
    %330 = vector.extract_strided_slice %327 {offsets = [0, 128], sizes = [8, 96], strides = [1, 1]} : vector<8x224xf32> to vector<8x96xf32>
    %331 = vector.extract_strided_slice %329 {offsets = [0, 0], sizes = [8, 64], strides = [1, 1]} : vector<8x96xf32> to vector<8x64xf32>
    %332 = vector.extract_strided_slice %330 {offsets = [0, 0], sizes = [8, 64], strides = [1, 1]} : vector<8x96xf32> to vector<8x64xf32>
    %333 = arith.addf %331, %332 : vector<8x64xf32>
    %334 = arith.negf %333 : vector<8x64xf32>
    %335 = math.exp %334 : vector<8x64xf32>
    %cst_94 = arith.constant 1.000000e+00 : f32
    %336 = vector.broadcast %cst_94 : f32 to vector<8x64xf32>
    %337 = arith.addf %336, %335 : vector<8x64xf32>
    %338 = arith.divf %336, %337 : vector<8x64xf32>
    %339 = vector.extract_strided_slice %338 {offsets = [0, 0], sizes = [8, 32], strides = [1, 1]} : vector<8x64xf32> to vector<8x32xf32>
    %340 = vector.extract_strided_slice %338 {offsets = [0, 32], sizes = [8, 32], strides = [1, 1]} : vector<8x64xf32> to vector<8x32xf32>
    %341 = vector.extract_strided_slice %329 {offsets = [0, 64], sizes = [8, 32], strides = [1, 1]} : vector<8x96xf32> to vector<8x32xf32>
    %342 = vector.extract_strided_slice %330 {offsets = [0, 64], sizes = [8, 32], strides = [1, 1]} : vector<8x96xf32> to vector<8x32xf32>
    %343 = arith.addf %342, %12 : vector<8x32xf32>
    %344 = arith.mulf %339, %343 : vector<8x32xf32>
    %345 = arith.addf %341, %344 : vector<8x32xf32>
    %346 = math.tanh %345 : vector<8x32xf32>
    %cst_95 = arith.constant 1.000000e+00 : f32
    %347 = vector.broadcast %cst_95 : f32 to vector<8x32xf32>
    %348 = arith.subf %347, %340 : vector<8x32xf32>
    %349 = arith.mulf %348, %346 : vector<8x32xf32>
    %350 = arith.mulf %340, %305 : vector<8x32xf32>
    %351 = arith.addf %349, %350 : vector<8x32xf32>
    %352 = tpu.concatenate %324, %351 in 1 : vector<8x32xf32>, vector<8x32xf32> -> vector<8x64xf32>
    %353 = arith.truncf %352 : vector<8x64xf32> to vector<8x64xbf16>
    %cst_96 = arith.constant dense<0.000000e+00> : vector<8x128xf32>
    %354 = tpu.matmul %353, %3, %cst_96 {dimension_numbers = #tpu.dot_dimension_numbers<[1], [0], [0], [1], [0, 0, 1, 1], [], []>} : vector<8x64xbf16>, vector<64x128xbf16>, vector<8x128xf32> -> vector<8x128xf32>
    %355 = arith.addf %354, %219 : vector<8x128xf32>
    %c3_97 = arith.constant 3 : index
    %c0_98 = arith.constant 0 : index
    %c0_99 = arith.constant 0 : index
    %356 = vector.load %arg8[%c3_97, %c0_98, %c0_99] : memref<6x8x128xf32, #tpu.memory_space<vmem>>, vector<1x8x128xf32>
    %357 = vector.shape_cast %356 : vector<1x8x128xf32> to vector<8x128xf32>
    %358 = vector.shape_cast %355 : vector<8x128xf32> to vector<1x8x128xf32>
    tpu.vector_store %arg8[%c3_97, %c0_98, %c0_99], %358 {strides = array<i32>} : memref<6x8x128xf32, #tpu.memory_space<vmem>>, vector<1x8x128xf32>,
    %c3_100 = arith.constant 3 : index
    %359 = memref.load %arg0[%c3_100] : memref<6xi32, #tpu.memory_space<smem>>
    %c0_i32_101 = arith.constant 0 : i32
    %360 = arith.cmpi ne, %359, %c0_i32_101 : i32
    %361 = arith.extui %360 : i1 to i32
    %c0_i32_102 = arith.constant 0 : i32
    %362 = arith.cmpi ne, %361, %c0_i32_102 : i32
    scf.if %362 {
      %c0_128 = arith.constant 0 : index
      %c3_129 = arith.constant 3 : index
      %451 = vector.load %arg3[%c0_128, %c3_129] : memref<8x6xi32, #tpu.memory_space<vmem>>, vector<8x1xi32>
      %c0_130 = arith.constant 0 : index
      %c0_131 = arith.constant 0 : index
      %452 = vector.load %arg9[%c0_130, %c0_131] : memref<8x1xi32, #tpu.memory_space<vmem>>, vector<8x1xi32>
      tpu.vector_store %arg9[%c0_130, %c0_131], %451 {strides = array<i32>} : memref<8x1xi32, #tpu.memory_space<vmem>>, vector<8x1xi32>,
    } else {
    }
    %c0_i32_103 = arith.constant 0 : i32
    %363 = arith.cmpi eq, %359, %c0_i32_103 : i32
    %364 = arith.extui %363 : i1 to i32
    %c0_i32_104 = arith.constant 0 : i32
    %365 = arith.cmpi ne, %364, %c0_i32_104 : i32
    scf.if %365 {
      %cst_128 = arith.constant dense<0xFF800000> : vector<8xf32>
      %451 = vector.multi_reduction <maximumf>, %355, %cst_128 [1] : vector<8x128xf32> to vector<8xf32>
      %452 = vector.shape_cast %451 : vector<8xf32> to vector<8x1xf32>
      %453 = vector.broadcast %452 : vector<8x1xf32> to vector<8x128xf32>
      %454 = arith.cmpf oeq, %355, %453 : vector<8x128xf32>
      %c128_i32 = arith.constant 128 : i32
      %455 = vector.broadcast %c128_i32 : i32 to vector<8x128xi32>
      %456 = arith.select %454, %221, %455 : vector<8x128xi1>, vector<8x128xi32>
      %cst_129 = arith.constant dense<2147483647> : vector<8xi32>
      %457 = vector.multi_reduction <minsi>, %456, %cst_129 [1] : vector<8x128xi32> to vector<8xi32>
      %458 = vector.shape_cast %457 : vector<8xi32> to vector<8x1xi32>
      %c0_130 = arith.constant 0 : index
      %c0_131 = arith.constant 0 : index
      %459 = vector.load %arg9[%c0_130, %c0_131] : memref<8x1xi32, #tpu.memory_space<vmem>>, vector<8x1xi32>
      tpu.vector_store %arg9[%c0_130, %c0_131], %458 {strides = array<i32>} : memref<8x1xi32, #tpu.memory_space<vmem>>, vector<8x1xi32>,
    } else {
    }
    %c0_105 = arith.constant 0 : index
    %c0_106 = arith.constant 0 : index
    %366 = vector.load %arg9[%c0_105, %c0_106] : memref<8x1xi32, #tpu.memory_space<vmem>>, vector<8x1xi32>
    %367 = vector.broadcast %366 : vector<8x1xi32> to vector<8x32xi32>
    %368 = arith.cmpi eq, %367, %220 : vector<8x32xi32>
    %369 = arith.extui %368 : vector<8x32xi1> to vector<8x32xi32>
    %370 = arith.sitofp %369 : vector<8x32xi32> to vector<8x32xf32>
    %371 = tpu.concatenate %370, %351 in 1 : vector<8x32xf32>, vector<8x32xf32> -> vector<8x64xf32>
    %372 = arith.truncf %371 : vector<8x64xf32> to vector<8x64xbf16>
    %cst_107 = arith.constant dense<0.000000e+00> : vector<8x224xf32>
    %373 = tpu.matmul %372, %2, %cst_107 {dimension_numbers = #tpu.dot_dimension_numbers<[1], [0], [0], [1], [0, 0, 1, 1], [], []>} : vector<8x64xbf16>, vector<64x224xbf16>, vector<8x224xf32> -> vector<8x224xf32>
    %374 = vector.extract_strided_slice %373 {offsets = [0, 0], sizes = [8, 96], strides = [1, 1]} : vector<8x224xf32> to vector<8x96xf32>
    %375 = arith.addf %374, %216 : vector<8x96xf32>
    %376 = vector.extract_strided_slice %373 {offsets = [0, 128], sizes = [8, 96], strides = [1, 1]} : vector<8x224xf32> to vector<8x96xf32>
    %377 = vector.extract_strided_slice %375 {offsets = [0, 0], sizes = [8, 64], strides = [1, 1]} : vector<8x96xf32> to vector<8x64xf32>
    %378 = vector.extract_strided_slice %376 {offsets = [0, 0], sizes = [8, 64], strides = [1, 1]} : vector<8x96xf32> to vector<8x64xf32>
    %379 = arith.addf %377, %378 : vector<8x64xf32>
    %380 = arith.negf %379 : vector<8x64xf32>
    %381 = math.exp %380 : vector<8x64xf32>
    %cst_108 = arith.constant 1.000000e+00 : f32
    %382 = vector.broadcast %cst_108 : f32 to vector<8x64xf32>
    %383 = arith.addf %382, %381 : vector<8x64xf32>
    %384 = arith.divf %382, %383 : vector<8x64xf32>
    %385 = vector.extract_strided_slice %384 {offsets = [0, 0], sizes = [8, 32], strides = [1, 1]} : vector<8x64xf32> to vector<8x32xf32>
    %386 = vector.extract_strided_slice %384 {offsets = [0, 32], sizes = [8, 32], strides = [1, 1]} : vector<8x64xf32> to vector<8x32xf32>
    %387 = vector.extract_strided_slice %375 {offsets = [0, 64], sizes = [8, 32], strides = [1, 1]} : vector<8x96xf32> to vector<8x32xf32>
    %388 = vector.extract_strided_slice %376 {offsets = [0, 64], sizes = [8, 32], strides = [1, 1]} : vector<8x96xf32> to vector<8x32xf32>
    %389 = arith.addf %388, %12 : vector<8x32xf32>
    %390 = arith.mulf %385, %389 : vector<8x32xf32>
    %391 = arith.addf %387, %390 : vector<8x32xf32>
    %392 = math.tanh %391 : vector<8x32xf32>
    %cst_109 = arith.constant 1.000000e+00 : f32
    %393 = vector.broadcast %cst_109 : f32 to vector<8x32xf32>
    %394 = arith.subf %393, %386 : vector<8x32xf32>
    %395 = arith.mulf %394, %392 : vector<8x32xf32>
    %396 = arith.mulf %386, %351 : vector<8x32xf32>
    %397 = arith.addf %395, %396 : vector<8x32xf32>
    %398 = tpu.concatenate %370, %397 in 1 : vector<8x32xf32>, vector<8x32xf32> -> vector<8x64xf32>
    %399 = arith.truncf %398 : vector<8x64xf32> to vector<8x64xbf16>
    %cst_110 = arith.constant dense<0.000000e+00> : vector<8x128xf32>
    %400 = tpu.matmul %399, %3, %cst_110 {dimension_numbers = #tpu.dot_dimension_numbers<[1], [0], [0], [1], [0, 0, 1, 1], [], []>} : vector<8x64xbf16>, vector<64x128xbf16>, vector<8x128xf32> -> vector<8x128xf32>
    %401 = arith.addf %400, %219 : vector<8x128xf32>
    %c4_111 = arith.constant 4 : index
    %c0_112 = arith.constant 0 : index
    %c0_113 = arith.constant 0 : index
    %402 = vector.load %arg8[%c4_111, %c0_112, %c0_113] : memref<6x8x128xf32, #tpu.memory_space<vmem>>, vector<1x8x128xf32>
    %403 = vector.shape_cast %402 : vector<1x8x128xf32> to vector<8x128xf32>
    %404 = vector.shape_cast %401 : vector<8x128xf32> to vector<1x8x128xf32>
    tpu.vector_store %arg8[%c4_111, %c0_112, %c0_113], %404 {strides = array<i32>} : memref<6x8x128xf32, #tpu.memory_space<vmem>>, vector<1x8x128xf32>,
    %c4_114 = arith.constant 4 : index
    %405 = memref.load %arg0[%c4_114] : memref<6xi32, #tpu.memory_space<smem>>
    %c0_i32_115 = arith.constant 0 : i32
    %406 = arith.cmpi ne, %405, %c0_i32_115 : i32
    %407 = arith.extui %406 : i1 to i32
    %c0_i32_116 = arith.constant 0 : i32
    %408 = arith.cmpi ne, %407, %c0_i32_116 : i32
    scf.if %408 {
      %c0_128 = arith.constant 0 : index
      %c4_129 = arith.constant 4 : index
      %451 = vector.load %arg3[%c0_128, %c4_129] : memref<8x6xi32, #tpu.memory_space<vmem>>, vector<8x1xi32>
      %c0_130 = arith.constant 0 : index
      %c0_131 = arith.constant 0 : index
      %452 = vector.load %arg9[%c0_130, %c0_131] : memref<8x1xi32, #tpu.memory_space<vmem>>, vector<8x1xi32>
      tpu.vector_store %arg9[%c0_130, %c0_131], %451 {strides = array<i32>} : memref<8x1xi32, #tpu.memory_space<vmem>>, vector<8x1xi32>,
    } else {
    }
    %c0_i32_117 = arith.constant 0 : i32
    %409 = arith.cmpi eq, %405, %c0_i32_117 : i32
    %410 = arith.extui %409 : i1 to i32
    %c0_i32_118 = arith.constant 0 : i32
    %411 = arith.cmpi ne, %410, %c0_i32_118 : i32
    scf.if %411 {
      %cst_128 = arith.constant dense<0xFF800000> : vector<8xf32>
      %451 = vector.multi_reduction <maximumf>, %401, %cst_128 [1] : vector<8x128xf32> to vector<8xf32>
      %452 = vector.shape_cast %451 : vector<8xf32> to vector<8x1xf32>
      %453 = vector.broadcast %452 : vector<8x1xf32> to vector<8x128xf32>
      %454 = arith.cmpf oeq, %401, %453 : vector<8x128xf32>
      %c128_i32 = arith.constant 128 : i32
      %455 = vector.broadcast %c128_i32 : i32 to vector<8x128xi32>
      %456 = arith.select %454, %221, %455 : vector<8x128xi1>, vector<8x128xi32>
      %cst_129 = arith.constant dense<2147483647> : vector<8xi32>
      %457 = vector.multi_reduction <minsi>, %456, %cst_129 [1] : vector<8x128xi32> to vector<8xi32>
      %458 = vector.shape_cast %457 : vector<8xi32> to vector<8x1xi32>
      %c0_130 = arith.constant 0 : index
      %c0_131 = arith.constant 0 : index
      %459 = vector.load %arg9[%c0_130, %c0_131] : memref<8x1xi32, #tpu.memory_space<vmem>>, vector<8x1xi32>
      tpu.vector_store %arg9[%c0_130, %c0_131], %458 {strides = array<i32>} : memref<8x1xi32, #tpu.memory_space<vmem>>, vector<8x1xi32>,
    } else {
    }
    %c0_119 = arith.constant 0 : index
    %c0_120 = arith.constant 0 : index
    %412 = vector.load %arg9[%c0_119, %c0_120] : memref<8x1xi32, #tpu.memory_space<vmem>>, vector<8x1xi32>
    %413 = vector.broadcast %412 : vector<8x1xi32> to vector<8x32xi32>
    %414 = arith.cmpi eq, %413, %220 : vector<8x32xi32>
    %415 = arith.extui %414 : vector<8x32xi1> to vector<8x32xi32>
    %416 = arith.sitofp %415 : vector<8x32xi32> to vector<8x32xf32>
    %417 = tpu.concatenate %416, %397 in 1 : vector<8x32xf32>, vector<8x32xf32> -> vector<8x64xf32>
    %418 = arith.truncf %417 : vector<8x64xf32> to vector<8x64xbf16>
    %cst_121 = arith.constant dense<0.000000e+00> : vector<8x224xf32>
    %419 = tpu.matmul %418, %2, %cst_121 {dimension_numbers = #tpu.dot_dimension_numbers<[1], [0], [0], [1], [0, 0, 1, 1], [], []>} : vector<8x64xbf16>, vector<64x224xbf16>, vector<8x224xf32> -> vector<8x224xf32>
    %420 = vector.extract_strided_slice %419 {offsets = [0, 0], sizes = [8, 96], strides = [1, 1]} : vector<8x224xf32> to vector<8x96xf32>
    %421 = arith.addf %420, %216 : vector<8x96xf32>
    %422 = vector.extract_strided_slice %419 {offsets = [0, 128], sizes = [8, 96], strides = [1, 1]} : vector<8x224xf32> to vector<8x96xf32>
    %423 = vector.extract_strided_slice %421 {offsets = [0, 0], sizes = [8, 64], strides = [1, 1]} : vector<8x96xf32> to vector<8x64xf32>
    %424 = vector.extract_strided_slice %422 {offsets = [0, 0], sizes = [8, 64], strides = [1, 1]} : vector<8x96xf32> to vector<8x64xf32>
    %425 = arith.addf %423, %424 : vector<8x64xf32>
    %426 = arith.negf %425 : vector<8x64xf32>
    %427 = math.exp %426 : vector<8x64xf32>
    %cst_122 = arith.constant 1.000000e+00 : f32
    %428 = vector.broadcast %cst_122 : f32 to vector<8x64xf32>
    %429 = arith.addf %428, %427 : vector<8x64xf32>
    %430 = arith.divf %428, %429 : vector<8x64xf32>
    %431 = vector.extract_strided_slice %430 {offsets = [0, 0], sizes = [8, 32], strides = [1, 1]} : vector<8x64xf32> to vector<8x32xf32>
    %432 = vector.extract_strided_slice %430 {offsets = [0, 32], sizes = [8, 32], strides = [1, 1]} : vector<8x64xf32> to vector<8x32xf32>
    %433 = vector.extract_strided_slice %421 {offsets = [0, 64], sizes = [8, 32], strides = [1, 1]} : vector<8x96xf32> to vector<8x32xf32>
    %434 = vector.extract_strided_slice %422 {offsets = [0, 64], sizes = [8, 32], strides = [1, 1]} : vector<8x96xf32> to vector<8x32xf32>
    %435 = arith.addf %434, %12 : vector<8x32xf32>
    %436 = arith.mulf %431, %435 : vector<8x32xf32>
    %437 = arith.addf %433, %436 : vector<8x32xf32>
    %438 = math.tanh %437 : vector<8x32xf32>
    %cst_123 = arith.constant 1.000000e+00 : f32
    %439 = vector.broadcast %cst_123 : f32 to vector<8x32xf32>
    %440 = arith.subf %439, %432 : vector<8x32xf32>
    %441 = arith.mulf %440, %438 : vector<8x32xf32>
    %442 = arith.mulf %432, %397 : vector<8x32xf32>
    %443 = arith.addf %441, %442 : vector<8x32xf32>
    %444 = tpu.concatenate %416, %443 in 1 : vector<8x32xf32>, vector<8x32xf32> -> vector<8x64xf32>
    %445 = arith.truncf %444 : vector<8x64xf32> to vector<8x64xbf16>
    %cst_124 = arith.constant dense<0.000000e+00> : vector<8x128xf32>
    %446 = tpu.matmul %445, %3, %cst_124 {dimension_numbers = #tpu.dot_dimension_numbers<[1], [0], [0], [1], [0, 0, 1, 1], [], []>} : vector<8x64xbf16>, vector<64x128xbf16>, vector<8x128xf32> -> vector<8x128xf32>
    %447 = arith.addf %446, %219 : vector<8x128xf32>
    %c5_125 = arith.constant 5 : index
    %c0_126 = arith.constant 0 : index
    %c0_127 = arith.constant 0 : index
    %448 = vector.load %arg8[%c5_125, %c0_126, %c0_127] : memref<6x8x128xf32, #tpu.memory_space<vmem>>, vector<1x8x128xf32>
    %449 = vector.shape_cast %448 : vector<1x8x128xf32> to vector<8x128xf32>
    %450 = vector.shape_cast %447 : vector<8x128xf32> to vector<1x8x128xf32>
    tpu.vector_store %arg8[%c5_125, %c0_126, %c0_127], %450 {strides = array<i32>} : memref<6x8x128xf32, #tpu.memory_space<vmem>>, vector<1x8x128xf32>,
    return
  }
}

</mosaic_0001>

<bundles_post_ra>
// kernel: _seq2seq_forward.1
= control target key start
LH: loop header
LB: loop body
LE: loop exit
PB: predicated region body
PF: predicated region fallthrough
CT: control target
= control target key end

     0   :  { %13 = vsyncpa [#allocation5], 0  ;;  %s2546_s0 = inlined_call_operand.vmem [shape: s32[6], index: 0, kind: input, shape index: {}]   ;;  %s2547_s1 = inlined_call_operand.vmem [shape: s32[8,1], index: 1, kind: input, shape index: {}]   ;;  %s2548_s2 = inlined_call_operand.vmem [shape: f32[7,8,96], index: 2, kind: input, shape index: {}]   ;;  %s2549_s3 = inlined_call_operand.vmem [shape: s32[8,6], index: 3, kind: input, shape index: {}]   ;;  %s2550_s4 = inlined_call_operand.vmem [shape: bf16[64,96], index: 4, kind: input, shape index: {}]   ;;  %s2551_s5 = inlined_call_operand.vmem [shape: bf16[64,224], index: 5, kind: input, shape index: {}]   ;;  %s2552_s6 = inlined_call_operand.vmem [shape: bf16[96,128], index: 6, kind: input, shape index: {}]   ;;  %s2553_s7 = inlined_call_operand.vmem [shape: f32[8,128], index: 7, kind: input, shape index: {}]   ;;  %s2554_s8 = inlined_call_operand.hbm [shape: f32[6,8,128], index: 8, kind: output, shape index: {}]  }
   0x1   :  { %14 = vsyncpa [#allocation4], 0  ;;  %s21_s29 = sshll.u32 %s2546_s0, 4  ;;  %s22_s29 = int_to_ptr.vmem [resolvable:$true] %s21_s29 }
   0x2   :  { %s1997_s30 = scalar_lea.vmem %s22_s29, 16  ;;  %p2002_p1 = scmp.lt.s32.totalorder %s22_s29, %s22_s29 }
   0x3   :  { %p1998_p0 = scmp.ne.s32.totalorder %s22_s29, %s1997_s30  ;;  %p2003_p2 = scmp.lt.s32.totalorder %s1997_s30, %s1997_s30 }
   0x5   :  { %p2004_p3 = por %p2003_p2, %p2002_p1 }
   0x7   :  { %p2005_p4 = pnand %p2004_p3, %p1998_p0 }
   0x9   :  { %2008 = shalt.err (!%p2005_p4)
}
   0xa   :  { %s2033_s9 = smov [#allocation3]  }
   0xb   :  { %24 = dma.vmem_to_smem %s22_s29, 16, %s2033_s9, [#allocation5]  }
   0xc   :  { %2029 = dma.done.wait [#allocation5], 16  }
   0xd   :  { %2030 = vsyncadd [#allocation5], 4294967280 }
   0xe   :  { %42 = sfence }
   0xf   :  { %v2097_v0 = vld [vmem:[%s2550_s4 + $0x8] sm:$0xff]   ;;  %v2034_v1 = vmov 0.0   ;;  %v2106_v2 = vld [vmem:[%s2550_s4] sm:$0xff]   ;;  %vm2035_vm0 = vmmov 0   ;;  %s2036_s15 = smov 64   ;;  %v2037_v4 = vmov 0  }
  0x10   :  { %1752 = vmatprep.subr.bf16.mxu0 %v2034_v1  ;;  %767 = vst [vmem:[#allocation6] sm:$0xff] %v2034_v1  ;;  %1760 = vmatprep.subr.bf16.mxu1 %v2034_v1  ;;  %v1625_v3 = vld [vmem:[%s2553_s7 + $0x2] ss:$0 sm:$0xff]  ;;  %s2038_s20 = smov 96   ;;  %vm101_vm2 = vcmask 261120   ;;  %v1630_v37 = vld [vmem:[%s2548_s2 + $0x8] sm:$0xff] }
  0x11   :  { %1753 = vmatpush3.bf16.msra.mxu0 %v2097_v0  ;;  %1756 = vmatprep.mubr.msk.bf16.mxu0 %vm2035_vm0, %v2034_v1  ;;  %v88_v11 = vld [vmem:[%s2548_s2] sm:$0xff]  ;;  %v1633_v61 = vld [vmem:[%s2548_s2 + $0x10] sm:$0xff]  ;;  %vm769_vm8 = vcmask 7168   ;;  %vm820_vm11 = vcmask 523264  }
  0x12   :  { %1754 = vmatprep.subr.bf16.mxu0 %v2034_v1  ;;  %153 = vrot.lane.b32.xlu0 %v1625_v3, %s2036_s15  ;;  %v84_v19 = vld [vmem:[%s2547_s1] sm:$0xff] }
  0x13   :  { %1897 = vset.pattern.permute.xlu1 %v2037_v4  ;;  %1761 = vmatpush3.bf16.msra.mxu1 %v2097_v0 }
  0x14   :  { %1762 = vmatprep.subr.bf16.mxu1 %v2034_v1  ;;  %1764 = vmatprep.mubr.msk.bf16.mxu1 %vm2035_vm0, %v2034_v1 }
  0x15   :  { %1755 = vmatpush3.bf16.msra.mxu0 %v2106_v2  ;;  %1898 = vset.pattern.permute.xlu0 %v2037_v4 }
  0x16   :  { %1768 = vmatprep.subr.bf16.mxu0 %v2034_v1 }
  0x17   :  { %1763 = vmatpush3.bf16.msra.mxu1 %v2106_v2 }
  0x18   :  { %1757 = vmatmul.mubr.bf16.vlgmr.msra.gmra.mxu0 %v2037_v4  ;;  %1776 = vmatprep.subr.bf16.mxu1 %v2034_v1 }
  0x19   :  { %1769 = vmatpush3.bf16.msra.mxu0 %v2097_v0  ;;  %1772 = vmatprep.mubr.msk.bf16.mxu0 %vm2035_vm0, %v2034_v1 }
  0x1a   :  { %1770 = vmatprep.subr.bf16.mxu0 %v2034_v1 }
  0x1d   :  { %1771 = vmatpush3.bf16.msra.mxu0 %v2106_v2 }
  0x1e   :  { %1784 = vmatprep.subr.bf16.mxu0 %v2034_v1 }
  0x84   :  { %v2132_v5 = vpop.permute.xlu0 %153 }
  0xd8   :  { %v139_v6 = vpop.f32.mrf.mxu0 }
  0xd9   :  { %v156_v7 = vadd.f32 %v2132_v5, %v139_v6  ;;  %v145_v12 = vadd.f32 %v139_v6, %v88_v11 }
  0xda   :  { %v1758_v8 = vpop.f32.mrf.mxu0 }
  0xdb   :  { %158 = vrot.lane.b32.xlu0 %v156_v7, %s2036_s15  ;;  %v1629_v13 = vmul.f32 -1.442695, %v145_v12 }
  0xdc   :  { %v142_v9 = vpop.f32.mrf.mxu0 }
  0xdd   :  { %1921 = vpow2.f32 %v1629_v13 }
  0xde   :  { %v1759_v10 = vpop.f32.mrf.mxu0 }
  0xea   :  { %v1922_v14 = vpop.eup %1921 }
  0xeb   :  { %v149_v15 = vadd.f32 1.0, %v1922_v14 }
  0xed   :  { %1923 = vrcp.f32 %v149_v15 }
  0xfa   :  { %v1924_v16 = vpop.eup %1923 }
  0xfb   :  { %v168_v23 = vsub.f32 1.0, %v1924_v16  ;;  %v174_v26 = vmul.f32 0.0, %v1924_v16 }
 0x14d   :  { %v159_v17 = vpop.permute.xlu0 %158 }
 0x14e   :  { %v161_v18 = vmul.f32 %v1924_v16, %v159_v17 }
 0x150   :  { %163 = vrot.lane.b32.xlu1 %v161_v18, %s2036_s15 }
 0x154   :  { %86 = vperm.xlu1 %1897, %v84_v19  }
 0x1c2   :  { %v164_v20 = vpop.permute.xlu1 %163 }
 0x1c3   :  { %v166_v21 = vadd.f32 %v164_v20, %v88_v11 }
 0x1c5   :  { %1925 = vtanh.f32 %v166_v21 }
 0x1cf   :  { %v2144_v24 = vpop.permute.xlu1 %86 }
 0x1d0   :  { %vm176_vm1 = vcmp.gt.s32.totalorder %v2144_v24, 0  ;;  %vm254_vm3 = vcmp.gt.s32.totalorder %v2144_v24, 1  ;;  %vm332_vm4 = vcmp.gt.s32.totalorder %v2144_v24, 2  ;;  %vm410_vm5 = vcmp.gt.s32.totalorder %v2144_v24, 3 }
 0x1d1   :  { %vm488_vm6 = vcmp.gt.s32.totalorder %v2144_v24, 4  ;;  %vm566_vm7 = vcmp.gt.s32.totalorder %v2144_v24, 5  ;;  %vm644_vm9 = vcmp.gt.s32.totalorder %v2144_v24, 6  ;;  %v2277_v24 = vld [vmem:[%s2551_s5 + $0x24] ss:$8 sps:$4 sm:$0xff]  }
 0x1d2   :  { %v1926_v22 = vpop.eup %1925 }
 0x1d3   :  { %170 = vrot.lane.b32.xlu0 %v1926_v22, %s2038_s20 }
 0x245   :  { %v171_v25 = vpop.permute.xlu0 %170 }
 0x246   :  { %v173_v27 = vmul.f32 %v171_v25, %v168_v23 }
 0x248   :  { %v175_v28 = vadd.f32 %v174_v26, %v173_v27  ;;  %v1636_v27 = vld [vmem:[%s2548_s2 + $0x18] sm:$0xff] }
 0x24a   :  { %v177_v29 = vsel %vm176_vm1, %v175_v28, 0.0 }
 0x24b   :  { %v180_v30 = vpack.c.bf16 %v177_v29, %v177_v29 }
 0x24d   :  { %182 = vrot.lane.b32.xlu1 %v180_v30, %s2038_s20 }
 0x2bf   :  { %v183_v31 = vpop.permute.xlu1 %182 }
 0x2c0   :  { %1765 = vmatmul.mubr.msk.bf16.vlgmr.msra.gmra.mxu1 %vm101_vm2, %v183_v31 }
 0x2c1   :  { %1777 = vmatpush3.bf16.msra.mxu1 %v2097_v0  ;;  %1780 = vmatprep.mubr.msk.bf16.mxu1 %vm2035_vm0, %v2034_v1 }
 0x2c2   :  { %1778 = vmatprep.subr.bf16.mxu1 %v2034_v1 }
 0x2c5   :  { %1779 = vmatpush3.bf16.msra.mxu1 %v2106_v2 }
 0x2c6   :  { %1792 = vmatprep.subr.bf16.mxu1 %v2034_v1 }
 0x380   :  { %v221_v32 = vpop.f32.mrf.mxu1 }
 0x381   :  { %v234_v33 = vadd.f32 %v221_v32, %v2132_v5  ;;  %v227_v38 = vadd.f32 %v1630_v37, %v221_v32 }
 0x382   :  { %v1766_v34 = vpop.f32.mrf.mxu1 }
 0x383   :  { %236 = vrot.lane.b32.xlu0 %v234_v33, %s2036_s15  ;;  %v1632_v39 = vmul.f32 -1.442695, %v227_v38 }
 0x384   :  { %v224_v35 = vpop.f32.mrf.mxu1 }
 0x385   :  { %1927 = vpow2.f32 %v1632_v39 }
 0x386   :  { %v1767_v36 = vpop.f32.mrf.mxu1 }
 0x392   :  { %v1928_v40 = vpop.eup %1927 }
 0x393   :  { %v231_v41 = vadd.f32 1.0, %v1928_v40 }
 0x395   :  { %1929 = vrcp.f32 %v231_v41 }
 0x3a2   :  { %v1930_v42 = vpop.eup %1929 }
 0x3a3   :  { %v246_v48 = vsub.f32 1.0, %v1930_v42  ;;  %v252_v50 = vmul.f32 %v1930_v42, %v177_v29 }
 0x3f5   :  { %v237_v43 = vpop.permute.xlu0 %236 }
 0x3f6   :  { %v239_v44 = vmul.f32 %v1930_v42, %v237_v43 }
 0x3f8   :  { %241 = vrot.lane.b32.xlu1 %v239_v44, %s2036_s15 }
 0x46a   :  { %v242_v45 = vpop.permute.xlu1 %241 }
 0x46b   :  { %v244_v46 = vadd.f32 %v1630_v37, %v242_v45 }
 0x46d   :  { %1931 = vtanh.f32 %v244_v46 }
 0x47a   :  { %v1932_v47 = vpop.eup %1931 }
 0x47b   :  { %248 = vrot.lane.b32.xlu0 %v1932_v47, %s2038_s20 }
 0x4ed   :  { %v249_v49 = vpop.permute.xlu0 %248 }
 0x4ee   :  { %v251_v51 = vmul.f32 %v249_v49, %v246_v48 }
 0x4f0   :  { %v253_v52 = vadd.f32 %v252_v50, %v251_v51 }
 0x4f2   :  { %v255_v53 = vsel %vm254_vm3, %v253_v52, %v177_v29 }
 0x4f3   :  { %v258_v54 = vpack.c.bf16 %v255_v53, %v255_v53 }
 0x4f5   :  { %260 = vrot.lane.b32.xlu1 %v258_v54, %s2038_s20 }
 0x567   :  { %v261_v55 = vpop.permute.xlu1 %260 }
 0x568   :  { %1773 = vmatmul.mubr.msk.bf16.vlgmr.msra.gmra.mxu0 %vm101_vm2, %v261_v55 }
 0x569   :  { %1785 = vmatpush3.bf16.msra.mxu0 %v2097_v0  ;;  %1788 = vmatprep.mubr.msk.bf16.mxu0 %vm2035_vm0, %v2034_v1 }
 0x56a   :  { %1786 = vmatprep.subr.bf16.mxu0 %v2034_v1 }
 0x56d   :  { %1787 = vmatpush3.bf16.msra.mxu0 %v2106_v2 }
 0x56e   :  { %1800 = vmatprep.subr.bf16.mxu0 %v2034_v1 }
 0x628   :  { %v299_v56 = vpop.f32.mrf.mxu0 }
 0x629   :  { %v312_v57 = vadd.f32 %v299_v56, %v2132_v5  ;;  %v305_v62 = vadd.f32 %v1633_v61, %v299_v56 }
 0x62a   :  { %v1774_v58 = vpop.f32.mrf.mxu0 }
 0x62b   :  { %314 = vrot.lane.b32.xlu0 %v312_v57, %s2036_s15  ;;  %v1635_v63 = vmul.f32 -1.442695, %v305_v62 }
 0x62c   :  { %v302_v59 = vpop.f32.mrf.mxu0 }
 0x62d   :  { %1933 = vpow2.f32 %v1635_v63 }
 0x62e   :  { %v1775_v60 = vpop.f32.mrf.mxu0 }
 0x63a   :  { %v1934_v3 = vpop.eup %1933 }
 0x63b   :  { %v309_v6 = vadd.f32 1.0, %v1934_v3 }
 0x63d   :  { %1935 = vrcp.f32 %v309_v6 }
 0x64a   :  { %v1936_v7 = vpop.eup %1935 }
 0x64b   :  { %v324_v13 = vsub.f32 1.0, %v1936_v7  ;;  %v330_v15 = vmul.f32 %v1936_v7, %v255_v53 }
 0x69d   :  { %v315_v8 = vpop.permute.xlu0 %314 }
 0x69e   :  { %v317_v9 = vmul.f32 %v1936_v7, %v315_v8 }
 0x6a0   :  { %319 = vrot.lane.b32.xlu1 %v317_v9, %s2036_s15 }
 0x712   :  { %v320_v10 = vpop.permute.xlu1 %319 }
 0x713   :  { %v322_v11 = vadd.f32 %v1633_v61, %v320_v10 }
 0x715   :  { %1937 = vtanh.f32 %v322_v11 }
 0x722   :  { %v1938_v12 = vpop.eup %1937 }
 0x723   :  { %326 = vrot.lane.b32.xlu0 %v1938_v12, %s2038_s20 }
 0x795   :  { %v327_v14 = vpop.permute.xlu0 %326 }
 0x796   :  { %v329_v16 = vmul.f32 %v327_v14, %v324_v13  ;;  %v1642_v14 = vld [vmem:[%s2548_s2 + $0x28] sm:$0xff] }
 0x798   :  { %v331_v17 = vadd.f32 %v330_v15, %v329_v16 }
 0x79a   :  { %v333_v18 = vsel %vm332_vm4, %v331_v17, %v255_v53 }
 0x79b   :  { %v336_v19 = vpack.c.bf16 %v333_v18, %v333_v18 }
 0x79d   :  { %338 = vrot.lane.b32.xlu1 %v336_v19, %s2038_s20 }
 0x80f   :  { %v339_v20 = vpop.permute.xlu1 %338 }
 0x810   :  { %1781 = vmatmul.mubr.msk.bf16.vlgmr.msra.gmra.mxu1 %vm101_vm2, %v339_v20 }
 0x811   :  { %1793 = vmatpush3.bf16.msra.mxu1 %v2097_v0  ;;  %1796 = vmatprep.mubr.msk.bf16.mxu1 %vm2035_vm0, %v2034_v1 }
 0x812   :  { %1794 = vmatprep.subr.bf16.mxu1 %v2034_v1 }
 0x815   :  { %1795 = vmatpush3.bf16.msra.mxu1 %v2106_v2 }
 0x816   :  { %1808 = vmatprep.subr.bf16.mxu1 %v2034_v1 }
 0x8d0   :  { %v377_v21 = vpop.f32.mrf.mxu1 }
 0x8d1   :  { %v390_v22 = vadd.f32 %v377_v21, %v2132_v5  ;;  %v383_v28 = vadd.f32 %v1636_v27, %v377_v21 }
 0x8d2   :  { %v1782_v23 = vpop.f32.mrf.mxu1 }
 0x8d3   :  { %392 = vrot.lane.b32.xlu0 %v390_v22, %s2036_s15  ;;  %v1638_v29 = vmul.f32 -1.442695, %v383_v28 }
 0x8d4   :  { %v380_v25 = vpop.f32.mrf.mxu1 }
 0x8d5   :  { %1939 = vpow2.f32 %v1638_v29 }
 0x8d6   :  { %v1783_v26 = vpop.f32.mrf.mxu1 }
 0x8e2   :  { %v1940_v30 = vpop.eup %1939 }
 0x8e3   :  { %v387_v31 = vadd.f32 1.0, %v1940_v30 }
 0x8e5   :  { %1941 = vrcp.f32 %v387_v31 }
 0x8f2   :  { %v1942_v32 = vpop.eup %1941 }
 0x8f3   :  { %v402_v38 = vsub.f32 1.0, %v1942_v32  ;;  %v408_v40 = vmul.f32 %v1942_v32, %v333_v18 }
 0x945   :  { %v393_v33 = vpop.permute.xlu0 %392 }
 0x946   :  { %v395_v34 = vmul.f32 %v1942_v32, %v393_v33 }
 0x948   :  { %397 = vrot.lane.b32.xlu1 %v395_v34, %s2036_s15 }
 0x9ba   :  { %v398_v35 = vpop.permute.xlu1 %397 }
 0x9bb   :  { %v400_v36 = vadd.f32 %v1636_v27, %v398_v35 }
 0x9bd   :  { %1943 = vtanh.f32 %v400_v36 }
 0x9ca   :  { %v1944_v37 = vpop.eup %1943 }
 0x9cb   :  { %404 = vrot.lane.b32.xlu0 %v1944_v37, %s2038_s20 }
 0xa3d   :  { %v405_v39 = vpop.permute.xlu0 %404 }
 0xa3e   :  { %v407_v41 = vmul.f32 %v405_v39, %v402_v38  ;;  %v1645_v39 = vld [vmem:[%s2548_s2 + $0x30] sm:$0xff] }
 0xa40   :  { %v409_v42 = vadd.f32 %v408_v40, %v407_v41 }
 0xa42   :  { %v411_v43 = vsel %vm410_vm5, %v409_v42, %v333_v18 }
 0xa43   :  { %v414_v44 = vpack.c.bf16 %v411_v43, %v411_v43 }
 0xa45   :  { %416 = vrot.lane.b32.xlu1 %v414_v44, %s2038_s20 }
 0xab7   :  { %v417_v45 = vpop.permute.xlu1 %416 }
 0xab8   :  { %1789 = vmatmul.mubr.msk.bf16.vlgmr.msra.gmra.mxu0 %vm101_vm2, %v417_v45 }
 0xab9   :  { %1801 = vmatpush3.bf16.msra.mxu0 %v2097_v0  ;;  %1804 = vmatprep.mubr.msk.bf16.mxu0 %vm2035_vm0, %v2034_v1  ;;  %v1639_v0 = vld [vmem:[%s2548_s2 + $0x20] sm:$0xff] }
 0xaba   :  { %1802 = vmatprep.subr.bf16.mxu0 %v2034_v1 }
 0xabd   :  { %1803 = vmatpush3.bf16.msra.mxu0 %v2106_v2 }
 0xabe   :  { %1816 = vmatprep.subr.bf16.mxu0 %v2034_v1 }
 0xb78   :  { %v455_v46 = vpop.f32.mrf.mxu0 }
 0xb79   :  { %v468_v47 = vadd.f32 %v455_v46, %v2132_v5  ;;  %v461_v51 = vadd.f32 %v1639_v0, %v455_v46 }
 0xb7a   :  { %v1790_v48 = vpop.f32.mrf.mxu0 }
 0xb7b   :  { %470 = vrot.lane.b32.xlu0 %v468_v47, %s2036_s15  ;;  %v1641_v52 = vmul.f32 -1.442695, %v461_v51  ;;  %v1902_v51 = vld [vmem:[%s2552_s6 + $0x28] sm:$0xff]  }
 0xb7c   :  { %v458_v49 = vpop.f32.mrf.mxu0 }
 0xb7d   :  { %1945 = vpow2.f32 %v1641_v52  ;;  %v1903_v52 = vld [vmem:[%s2550_s4 + $0x10] sm:$0xff]  }
 0xb7e   :  { %v1791_v50 = vpop.f32.mrf.mxu0 }
 0xb8a   :  { %v1946_v53 = vpop.eup %1945 }
 0xb8b   :  { %v465_v54 = vadd.f32 1.0, %v1946_v53  ;;  %v1904_v53 = vld [vmem:[%s2552_s6 + $0x20] sm:$0xff]  }
 0xb8d   :  { %1947 = vrcp.f32 %v465_v54  ;;  %v2255_v54 = vld [vmem:[%s2551_s5 + $0x34] ss:$8 sps:$4 sm:$0xff]  }
 0xb9a   :  { %v1948_v2 = vpop.eup %1947 }
 0xb9b   :  { %v480_v60 = vsub.f32 1.0, %v1948_v2  ;;  %v486_v62 = vmul.f32 %v1948_v2, %v411_v43 }
 0xbed   :  { %v471_v55 = vpop.permute.xlu0 %470 }
 0xbee   :  { %v473_v56 = vmul.f32 %v1948_v2, %v471_v55 }
 0xbf0   :  { %475 = vrot.lane.b32.xlu1 %v473_v56, %s2036_s15 }
 0xc62   :  { %v476_v57 = vpop.permute.xlu1 %475 }
 0xc63   :  { %v478_v58 = vadd.f32 %v1639_v0, %v476_v57  ;;  %v1901_v0 = vld [vmem:[%s2550_s4 + $0x18] sm:$0xff]  }
 0xc65   :  { %1949 = vtanh.f32 %v478_v58 }
 0xc72   :  { %v1950_v59 = vpop.eup %1949 }
 0xc73   :  { %482 = vrot.lane.b32.xlu0 %v1950_v59, %s2038_s20 }
 0xce5   :  { %v483_v61 = vpop.permute.xlu0 %482 }
 0xce6   :  { %v485_v63 = vmul.f32 %v483_v61, %v480_v60  ;;  %v1626_v61 = vld [vmem:[%s2553_s7 + $0x3] ss:$0 sm:$0xff] }
 0xce8   :  { %v487_v3 = vadd.f32 %v486_v62, %v485_v63  ;;  %v765_v62 = vlaneseq  ;;  %v2272_v63 = vld [vmem:[%s2551_s5 + $0x30] ss:$8 sps:$4 sm:$0xff]  }
 0xcea   :  { %v489_v6 = vsel %vm488_vm6, %v487_v3, %v411_v43 }
 0xceb   :  { %v492_v7 = vpack.c.bf16 %v489_v6, %v489_v6 }
 0xced   :  { %494 = vrot.lane.b32.xlu1 %v492_v7, %s2038_s20  ;;  %v2287_v7 = vld [vmem:[%s2551_s5 + $0x20] ss:$8 sps:$4 sm:$0xff]  }
 0xd5f   :  { %v495_v8 = vpop.permute.xlu1 %494 }
 0xd60   :  { %1797 = vmatmul.mubr.msk.bf16.vlgmr.msra.gmra.mxu1 %vm101_vm2, %v495_v8 }
 0xd61   :  { %1812 = vmatprep.mubr.msk.bf16.mxu1 %vm2035_vm0, %v2034_v1  ;;  %1809 = vmatpush3.bf16.msra.mxu1 %v1901_v0 }
 0xd62   :  { %1810 = vmatprep.subr.bf16.mxu1 %v2034_v1 }
 0xd65   :  { %1811 = vmatpush3.bf16.msra.mxu1 %v1903_v52 }
 0xd66   :  { %832 = vmatprep.subr.bf16.mxu1 %v2255_v54 }
 0xe20   :  { %v533_v9 = vpop.f32.mrf.mxu1 }
 0xe21   :  { %v546_v10 = vadd.f32 %v533_v9, %v2132_v5  ;;  %v539_v15 = vadd.f32 %v1642_v14, %v533_v9  ;;  %v2294_v9 = vld [vmem:[%s2551_s5 + $0x14] ss:$8 sps:$4 sm:$0xff]  }
 0xe22   :  { %v1798_v11 = vpop.f32.mrf.mxu1 }
 0xe23   :  { %548 = vrot.lane.b32.xlu0 %v546_v10, %s2036_s15  ;;  %v1644_v16 = vmul.f32 -1.442695, %v539_v15  ;;  %v2303_v10 = vld [vmem:[%s2551_s5 + $0x10] ss:$8 sps:$4 sm:$0xff]   ;;  %v2309_v11 = vld [vmem:[%s2551_s5 + $0x4] ss:$8 sps:$4 sm:$0xff]  }
 0xe24   :  { %v536_v12 = vpop.f32.mrf.mxu1 }
 0xe25   :  { %1951 = vpow2.f32 %v1644_v16 }
 0xe26   :  { %v1799_v13 = vpop.f32.mrf.mxu1 }
 0xe27   :  { %v2316_v13 = vld [vmem:[%s2551_s5] ss:$8 sps:$4 sm:$0xff]  }
 0xe32   :  { %v1952_v17 = vpop.eup %1951 }
 0xe33   :  { %v543_v18 = vadd.f32 1.0, %v1952_v17 }
 0xe35   :  { %1953 = vrcp.f32 %v543_v18 }
 0xe42   :  { %v1954_v19 = vpop.eup %1953 }
 0xe43   :  { %v558_v26 = vsub.f32 1.0, %v1954_v19  ;;  %v564_v28 = vmul.f32 %v1954_v19, %v489_v6 }
 0xe95   :  { %v549_v20 = vpop.permute.xlu0 %548 }
 0xe96   :  { %v551_v21 = vmul.f32 %v1954_v19, %v549_v20 }
 0xe98   :  { %553 = vrot.lane.b32.xlu1 %v551_v21, %s2036_s15 }
 0xf0a   :  { %v554_v22 = vpop.permute.xlu1 %553 }
 0xf0b   :  { %v556_v23 = vadd.f32 %v1642_v14, %v554_v22 }
 0xf0d   :  { %1955 = vtanh.f32 %v556_v23 }
 0xf1a   :  { %v1956_v25 = vpop.eup %1955 }
 0xf1b   :  { %560 = vrot.lane.b32.xlu0 %v1956_v25, %s2038_s20  ;;  %v1648_v25 = vld [vmem:[%s2553_s7] ss:$0 sm:$0xff] }
 0xf8d   :  { %v561_v27 = vpop.permute.xlu0 %560 }
 0xf8e   :  { %v563_v29 = vmul.f32 %v561_v27, %v558_v26 }
 0xf90   :  { %v565_v30 = vadd.f32 %v564_v28, %v563_v29 }
 0xf92   :  { %v567_v31 = vsel %vm566_vm7, %v565_v30, %v489_v6  ;;  %v2281_v6 = vand.u32 127, %v765_v62 }
 0xf93   :  { %v570_v32 = vpack.c.bf16 %v567_v31, %v567_v31 }
 0xf95   :  { %572 = vrot.lane.b32.xlu1 %v570_v32, %s2038_s20 }
0x1007   :  { %v573_v33 = vpop.permute.xlu1 %572 }
0x1008   :  { %1805 = vmatmul.mubr.msk.bf16.vlgmr.msra.gmra.mxu0 %vm101_vm2, %v573_v33 }
0x1009   :  { %1820 = vmatprep.mubr.msk.bf16.mxu0 %vm2035_vm0, %v2034_v1  ;;  %1817 = vmatpush3.bf16.msra.mxu0 %v1902_v51 }
0x100a   :  { %1818 = vmatprep.subr.bf16.mxu0 %v2034_v1 }
0x100d   :  { %1819 = vmatpush3.bf16.msra.mxu0 %v1904_v53  ;;  %v1652_v53 = vld [vmem:[%s2553_s7 + $0x1] ss:$0 sm:$0xff] }
0x100e   :  { %1824 = vmatprep.subr.bf16.mxu0 %v2034_v1 }
0x10c8   :  { %v611_v34 = vpop.f32.mrf.mxu0 }
0x10c9   :  { %v624_v35 = vadd.f32 %v611_v34, %v2132_v5  ;;  %v617_v40 = vadd.f32 %v1645_v39, %v611_v34  ;;  %v768_v5 = vld [vmem:[%s2549_s3] sm:$0xff] }
0x10ca   :  { %v1806_v36 = vpop.f32.mrf.mxu0  ;;  %770 = vst.msk [vmem:[#allocation2] sm:$0xff] %vm769_vm8, %v768_v5 }
0x10cb   :  { %626 = vrot.lane.b32.xlu0 %v624_v35, %s2036_s15  ;;  %v1647_v41 = vmul.f32 -1.442695, %v617_v40 }
0x10cc   :  { %v614_v37 = vpop.f32.mrf.mxu0 }
0x10cd   :  { %1957 = vpow2.f32 %v1647_v41  ;;  %v2337_v41 = vld [vmem:[%s2552_s6 + $0x18] sm:$0xff]  }
0x10ce   :  { %v1807_v38 = vpop.f32.mrf.mxu0 }
0x10d1   :  { %v771_v50 = vld [vmem:[#allocation2] sm:$0xff] }
0x10da   :  { %v1958_v42 = vpop.eup %1957 }
0x10db   :  { %v621_v43 = vadd.f32 1.0, %v1958_v42  ;;  %v2343_v42 = vld [vmem:[%s2552_s6 + $0x10] sm:$0xff]  }
0x10dd   :  { %1959 = vrcp.f32 %v621_v43 }
0x10ea   :  { %v1960_v44 = vpop.eup %1959 }
0x10eb   :  { %v636_v2 = vsub.f32 1.0, %v1960_v44  ;;  %v642_v56 = vmul.f32 %v1960_v44, %v567_v31 }
0x113d   :  { %v627_v45 = vpop.permute.xlu0 %626 }
0x113e   :  { %v629_v46 = vmul.f32 %v1960_v44, %v627_v45  ;;  %v2351_v45 = vld [vmem:[%s2552_s6 + $0x8] sm:$0xff]  }
0x1140   :  { %631 = vrot.lane.b32.xlu1 %v629_v46, %s2036_s15  ;;  %v2358_v46 = vld [vmem:[%s2552_s6] sm:$0xff]   ;;  %s1672_s6 = sld [smem:[#allocation3 + $0x1]] }
0x1146   :  { %p1673_p5 = scmp.eq.s32.totalorder %s1672_s6, 0 }
0x1147   :  { %s2039_s25 = smov (!%p1673_p5), 127  }
0x11b2   :  { %v632_v47 = vpop.permute.xlu1 %631 }
0x11b3   :  { %v634_v48 = vadd.f32 %v1645_v39, %v632_v47 }
0x11b5   :  { %1961 = vtanh.f32 %v634_v48 }
0x11c2   :  { %v1962_v49 = vpop.eup %1961 }
0x11c3   :  { %638 = vrot.lane.b32.xlu0 %v1962_v49, %s2038_s20 }
0x11c7   :  { %773 = vperm.xlu0 %1898, %v771_v50  }
0x1235   :  { %v639_v55 = vpop.permute.xlu0 %638 }
0x1236   :  { %v641_v57 = vmul.f32 %v639_v55, %v636_v2 }
0x1238   :  { %v643_v58 = vadd.f32 %v642_v56, %v641_v57 }
0x123a   :  { %v2260_v59 = vsel %vm644_vm9, %v643_v58, %v567_v31 }
0x123b   :  { %v646_v60 = vpack.c.bf16 %v2260_v59, %v2260_v59 }
0x123d   :  { %652 = vrot.lane.b32.xlu1 %v646_v60, %s2038_s20 }
0x1241   :  { %874 = vrot.lane.b32.xlu1 %v1626_v61, %s2036_s15 }
0x1242   :  { %v774_v8 = vpop.permute.xlu0 %773 }
0x1243   :  { %vm775_vm10 = vcmp.eq.s32.totalorder %v774_v8, %v2281_v6 }
0x1244   :  { %v1656_v12 = vsel %vm775_vm10, 1.0, %v2034_v1 }
0x1245   :  { %v778_v14 = vsel %vm101_vm2, %v1656_v12, %v2260_v59 }
0x1246   :  { %v779_v15 = vpack.c.bf16 %v778_v14, %v778_v14 }
0x12af   :  { %v653_v3 = vpop.permute.xlu1 %652 }
0x12b0   :  { %1813 = vmatmul.mubr.msk.bf16.vlgmr.msra.gmra.mxu1 %vm101_vm2, %v653_v3  ;;  %1821 = vmatmul.mubr.msk.bf16.vlgmr.msra.gmra.mxu0 %vm101_vm2, %v653_v3 }
0x12b1   :  { %833 = vmatpush1.bf16.msra.mxu1 %v2272_v63  ;;  %856 = vmatprep.mubr.bf16.mxu1 %v2037_v4 }
0x12b2   :  { %834 = vmatprep.subr.bf16.mxu1 %v2277_v24  ;;  %1832 = vmatprep.mubr.msk.bf16.mxu0 %vm2035_vm0, %v2034_v1 }
0x12b3   :  { %v2328_v28 = vpop.permute.xlu1 %874  ;;  %1825 = vmatpush3.bf16.msra.mxu0 %v2337_v41 }
0x12b4   :  { %1826 = vmatprep.subr.bf16.mxu0 %v2034_v1 }
0x12b5   :  { %835 = vmatpush1.bf16.msra.mxu1 %v2287_v7 }
0x12b6   :  { %836 = vmatprep.subr.bf16.mxu1 %v2294_v9 }
0x12b7   :  { %1827 = vmatpush3.bf16.msra.mxu0 %v2343_v42 }
0x12b8   :  { %1828 = vmatprep.subr.bf16.mxu0 %v2034_v1 }
0x12b9   :  { %837 = vmatpush1.bf16.msra.mxu1 %v2303_v10 }
0x12ba   :  { %838 = vmatprep.subr.bf16.mxu1 %v2309_v11 }
0x12bb   :  { %1829 = vmatpush3.bf16.msra.mxu0 %v2351_v45 }
0x12bc   :  { %1830 = vmatprep.subr.bf16.mxu0 %v2034_v1 }
0x12bd   :  { %839 = vmatpush1.bf16.msra.mxu1 %v2316_v13 }
0x12bf   :  { %1831 = vmatpush3.bf16.msra.mxu0 %v2358_v46 }
0x12c0   :  { %1665 = vmatmul.mubr.msk.bf16.vlgmr.msra.gmra.mxu1 %vm820_vm11, %v779_v15 }
0x1370   :  { %v703_v16 = vpop.f32.mrf.mxu1  ;;  %v759_v17 = vpop.f32.mrf.mxu0 }
0x1371   :  { %v2326_v26 = vadd.f32 %v1648_v25, %v703_v16  ;;  %v2371_v2 = vadd.f32 %v1652_v53, %v759_v17 }
0x1372   :  { %v1814_v18 = vpop.f32.mrf.mxu1  ;;  %v1822_v19 = vpop.f32.mrf.mxu0 }
0x1374   :  { %v706_v20 = vpop.f32.mrf.mxu1  ;;  %v762_v21 = vpop.f32.mrf.mxu0 }
0x1376   :  { %v1815_v22 = vpop.f32.mrf.mxu1  ;;  %v1823_v23 = vpop.f32.mrf.mxu0 }
0x1380   :  { %v858_v27 = vpop.f32.mrf.mxu1 }
0x1381   :  { %v865_v29 = vadd.f32 %v858_v27, %v2326_v26 }
0x1382   :  { %v860_v30 = vpop.f32.mrf.mxu1 }
0x1383   :  { %v877_v31 = vadd.f32 %v2328_v28, %v860_v30  ;;  %v866_v34 = vadd.f32 %v865_v29, %v860_v30 }
0x1384   :  { %v862_v32 = vpop.f32.mrf.mxu1 }
0x1385   :  { %879 = vrot.lane.b32.xlu1 %v877_v31, %s2036_s15  ;;  %v1666_v35 = vmul.f32 -1.442695, %v866_v34 }
0x1386   :  { %v863_v33 = vpop.f32.mrf.mxu1 }
0x1387   :  { %1963 = vpow2.f32 %v1666_v35 }
0x1394   :  { %v1964_v36 = vpop.eup %1963 }
0x1395   :  { %v870_v37 = vadd.f32 1.0, %v1964_v36 }
0x1397   :  { %1965 = vrcp.f32 %v870_v37 }
0x13a4   :  { %v1966_v38 = vpop.eup %1965 }
0x13a5   :  { %v889_v47 = vsub.f32 1.0, %v1966_v38  ;;  %v895_v49 = vmul.f32 %v1966_v38, %v2260_v59 }
0x13f7   :  { %v880_v39 = vpop.permute.xlu1 %879 }
0x13f8   :  { %v882_v40 = vmul.f32 %v1966_v38, %v880_v39 }
0x13fa   :  { %884 = vrot.lane.b32.xlu0 %v882_v40, %s2036_s15 }
0x146c   :  { %v885_v43 = vpop.permute.xlu0 %884 }
0x146d   :  { %v887_v44 = vadd.f32 %v885_v43, %v865_v29 }
0x146f   :  { %1967 = vtanh.f32 %v887_v44 }
0x147c   :  { %v1968_v5 = vpop.eup %1967 }
0x147d   :  { %891 = vrot.lane.b32.xlu1 %v1968_v5, %s2038_s20 }
0x14ef   :  { %v892_v48 = vpop.permute.xlu1 %891 }
0x14f0   :  { %v894_v50 = vmul.f32 %v892_v48, %v889_v47 }
0x14f2   :  { %v2363_v0 = vadd.f32 %v895_v49, %v894_v50 }
0x14f4   :  { %v897_v51 = vsel %vm101_vm2, %v1656_v12, %v2363_v0 }
0x14f5   :  { %v898_v52 = vpack.c.bf16 %v897_v51, %v897_v51 }
0x14f7   :  { %1833 = vmatmul.mubr.msk.bf16.vlgmr.msra.gmra.mxu0 %vm820_vm11, %v898_v52 }
0x15b7   :  { %v960_v55 = vpop.f32.mrf.mxu0 }
0x15b8   :  { %v961_v56 = vadd.f32 %v960_v55, %v2371_v2 }
0x15b9   :  { %v1834_v57 = vpop.f32.mrf.mxu0  ;;  %972 = sbr.rel (%p1673_p5) target bundleno = 5683 (0x1633), region = 41 }
0x15ba   :  { %967 = vst [vmem:[#allocation6 + $0x8] sm:$0xff] %v961_v56 }
0x15bb   :  { %v963_v58 = vpop.f32.mrf.mxu0 }
0x15bd   :  { %v1835_v59 = vpop.f32.mrf.mxu0 }
0x15be   :  { %v973_v60 = vld [vmem:[%s2549_s3] sm:$0xff] }
0x15bf   :  { %974 = vrot.lane.b32.xlu0 %v973_v60, %s2039_s25 }
0x1631   :  { %v975_v61 = vpop.permute.xlu0 %974 }
0x1632   :  { %976 = vst.msk [vmem:[#allocation2] sm:$0xff] %vm769_vm8, %v975_v61 }
0x1633 PF:  { %p1674_p6 = scmp.ne.s32.totalorder %s1672_s6, 0 }
0x1635   :  { %980 = sbr.rel (%p1674_p6) target bundleno = 6117 (0x17e5), region = 45 }
0x163a   :  { %981 = vmax.xlane.f32.xlu0 %v961_v56 }
0x16c3   :  { %v982_v62 = vpop.xlane.xlu0 %981 }
0x16c4   :  { %vm983_vm12 = vcmp.eq.f32.partialorder %v961_v56, %v982_v62 }
0x16c5   :  { %v984_v3 = vsel %vm983_vm12, %v2281_v6, 128 }
0x16c6   :  { %v986_v8 = vshra.s32 %v984_v3, 16  ;;  %v985_v14 = vand.u32 65535, %v984_v3 }
0x16c8   :  { %v988_v12 = vcvt.s32.f32 %v986_v8  ;;  %v987_v16 = vcvt.s32.f32 %v985_v14 }
0x16ca   :  { %989 = vmin.xlane.f32.xlu0 %v988_v12 }
0x1753   :  { %v990_v15 = vpop.xlane.xlu0 %989 }
0x1754   :  { %vm991_vm13 = vcmp.eq.f32.partialorder %v988_v12, %v990_v15  ;;  %v996_v18 = vcvt.f32.s32 %v990_v15 }
0x1755   :  { %v992_v17 = vsel %vm991_vm13, %v987_v16, inf }
0x1756   :  { %993 = vmin.xlane.f32.xlu1 %v992_v17  ;;  %v997_v20 = vshll.u32 %v996_v18, 16 }
0x17df   :  { %v994_v19 = vpop.xlane.xlu1 %993 }
0x17e0   :  { %v995_v21 = vcvt.f32.s32 %v994_v19 }
0x17e2   :  { %v998_v22 = vadd.s32 %v997_v20, %v995_v21 }
0x17e4   :  { %999 = vst.msk [vmem:[#allocation2] sm:$0xff] %vm769_vm8, %v998_v22 }
0x17e5 PF:  { %1969 = vset.pattern.permute.xlu0 %v2037_v4  ;;  %1020 = vmatprep.subr.bf16.mxu1 %v2255_v54  ;;  %s1679_s7 = sld [smem:[#allocation3 + $0x2]] }
0x17e6   :  { %1021 = vmatpush1.bf16.msra.mxu1 %v2272_v63  ;;  %1044 = vmatprep.mubr.bf16.mxu1 %v2037_v4 }
0x17e7   :  { %1022 = vmatprep.subr.bf16.mxu1 %v2277_v24  ;;  %1836 = vmatprep.subr.bf16.mxu0 %v2034_v1 }
0x17e8   :  { %1844 = vmatprep.mubr.msk.bf16.mxu0 %vm2035_vm0, %v2034_v1  ;;  %1837 = vmatpush3.bf16.msra.mxu0 %v2337_v41 }
0x17e9   :  { %1838 = vmatprep.subr.bf16.mxu0 %v2034_v1 }
0x17ea   :  { %1023 = vmatpush1.bf16.msra.mxu1 %v2287_v7 }
0x17eb   :  { %v1000_v23 = vld [vmem:[#allocation2] sm:$0xff]  ;;  %1024 = vmatprep.subr.bf16.mxu1 %v2294_v9  ;;  %p1680_p7 = scmp.eq.s32.totalorder %s1679_s7, 0 }
0x17ec   :  { %1002 = vperm.xlu0 %1969, %v1000_v23   ;;  %1839 = vmatpush3.bf16.msra.mxu0 %v2343_v42  ;;  %s2040_s28 = smov (!%p1680_p7), 126  }
0x17ed   :  { %1840 = vmatprep.subr.bf16.mxu0 %v2034_v1 }
0x17ee   :  { %1025 = vmatpush1.bf16.msra.mxu1 %v2303_v10 }
0x17ef   :  { %1026 = vmatprep.subr.bf16.mxu1 %v2309_v11 }
0x17f0   :  { %1841 = vmatpush3.bf16.msra.mxu0 %v2351_v45 }
0x17f1   :  { %1842 = vmatprep.subr.bf16.mxu0 %v2034_v1 }
0x17f2   :  { %1027 = vmatpush1.bf16.msra.mxu1 %v2316_v13 }
0x17f4   :  { %1843 = vmatpush3.bf16.msra.mxu0 %v2358_v46 }
0x1867   :  { %v1003_v25 = vpop.permute.xlu0 %1002 }
0x1868   :  { %vm1004_vm14 = vcmp.eq.s32.totalorder %v1003_v25, %v2281_v6 }
0x1869   :  { %v1675_v27 = vsel %vm1004_vm14, 1.0, %v2034_v1 }
0x186a   :  { %v1007_v29 = vsel %vm101_vm2, %v1675_v27, %v2363_v0 }
0x186b   :  { %v1008_v30 = vpack.c.bf16 %v1007_v29, %v1007_v29 }
0x186d   :  { %1676 = vmatmul.mubr.msk.bf16.vlgmr.msra.gmra.mxu1 %vm820_vm11, %v1008_v30 }
0x192d   :  { %v1046_v31 = vpop.f32.mrf.mxu1 }
0x192e   :  { %v1053_v36 = vadd.f32 %v1046_v31, %v2326_v26 }
0x192f   :  { %v1048_v32 = vpop.f32.mrf.mxu1 }
0x1930   :  { %v1061_v33 = vadd.f32 %v1048_v32, %v2328_v28  ;;  %v1054_v37 = vadd.f32 %v1053_v36, %v1048_v32 }
0x1931   :  { %v1050_v34 = vpop.f32.mrf.mxu1 }
0x1932   :  { %1063 = vrot.lane.b32.xlu0 %v1061_v33, %s2036_s15  ;;  %v1677_v38 = vmul.f32 -1.442695, %v1054_v37 }
0x1933   :  { %v1051_v35 = vpop.f32.mrf.mxu1 }
0x1934   :  { %1970 = vpow2.f32 %v1677_v38 }
0x1941   :  { %v1971_v39 = vpop.eup %1970 }
0x1942   :  { %v1058_v40 = vadd.f32 1.0, %v1971_v39 }
0x1944   :  { %1972 = vrcp.f32 %v1058_v40 }
0x1951   :  { %v1973_v43 = vpop.eup %1972 }
0x1952   :  { %v1073_v50 = vsub.f32 1.0, %v1973_v43  ;;  %v1079_v52 = vmul.f32 %v1973_v43, %v2363_v0 }
0x19a4   :  { %v1064_v44 = vpop.permute.xlu0 %1063 }
0x19a5   :  { %v1066_v5 = vmul.f32 %v1973_v43, %v1064_v44 }
0x19a7   :  { %1068 = vrot.lane.b32.xlu1 %v1066_v5, %s2036_s15 }
0x1a19   :  { %v1069_v47 = vpop.permute.xlu1 %1068 }
0x1a1a   :  { %v1071_v48 = vadd.f32 %v1069_v47, %v1053_v36 }
0x1a1c   :  { %1974 = vtanh.f32 %v1071_v48 }
0x1a29   :  { %v1975_v49 = vpop.eup %1974 }
0x1a2a   :  { %1075 = vrot.lane.b32.xlu1 %v1975_v49, %s2038_s20 }
0x1a9c   :  { %v1076_v51 = vpop.permute.xlu1 %1075 }
0x1a9d   :  { %v1078_v53 = vmul.f32 %v1076_v51, %v1073_v50 }
0x1a9f   :  { %v2411_v55 = vadd.f32 %v1079_v52, %v1078_v53 }
0x1aa1   :  { %v1081_v56 = vsel %vm101_vm2, %v1675_v27, %v2411_v55 }
0x1aa2   :  { %v1082_v57 = vpack.c.bf16 %v1081_v56, %v1081_v56 }
0x1aa4   :  { %1845 = vmatmul.mubr.msk.bf16.vlgmr.msra.gmra.mxu0 %vm820_vm11, %v1082_v57 }
0x1b64   :  { %v1120_v58 = vpop.f32.mrf.mxu0 }
0x1b65   :  { %v1121_v59 = vadd.f32 %v1120_v58, %v2371_v2 }
0x1b66   :  { %v1846_v60 = vpop.f32.mrf.mxu0  ;;  %1132 = sbr.rel (%p1680_p7) target bundleno = 7136 (0x1be0), region = 49 }
0x1b67   :  { %1127 = vst [vmem:[#allocation6 + $0x10] sm:$0xff] %v1121_v59 }
0x1b68   :  { %v1123_v61 = vpop.f32.mrf.mxu0 }
0x1b6a   :  { %v1847_v62 = vpop.f32.mrf.mxu0 }
0x1b6b   :  { %v1133_v0 = vld [vmem:[%s2549_s3] sm:$0xff] }
0x1b6c   :  { %1134 = vrot.lane.b32.xlu0 %v1133_v0, %s2040_s28 }
0x1bde   :  { %v1135_v3 = vpop.permute.xlu0 %1134 }
0x1bdf   :  { %1136 = vst.msk [vmem:[#allocation2] sm:$0xff] %vm769_vm8, %v1135_v3 }
0x1be0 PF:  { %p1681_p8 = scmp.ne.s32.totalorder %s1679_s7, 0 }
0x1be2   :  { %1140 = sbr.rel (%p1681_p8) target bundleno = 7570 (0x1d92), region = 53 }
0x1be7   :  { %1141 = vmax.xlane.f32.xlu0 %v1121_v59 }
0x1c70   :  { %v1142_v8 = vpop.xlane.xlu0 %1141 }
0x1c71   :  { %vm1143_vm15 = vcmp.eq.f32.partialorder %v1121_v59, %v1142_v8 }
0x1c72   :  { %v1144_v12 = vsel %vm1143_vm15, %v2281_v6, 128 }
0x1c73   :  { %v1146_v14 = vshra.s32 %v1144_v12, 16  ;;  %v1145_v16 = vand.u32 65535, %v1144_v12 }
0x1c75   :  { %v1148_v15 = vcvt.s32.f32 %v1146_v14  ;;  %v1147_v18 = vcvt.s32.f32 %v1145_v16 }
0x1c77   :  { %1149 = vmin.xlane.f32.xlu0 %v1148_v15 }
0x1d00   :  { %v1150_v17 = vpop.xlane.xlu0 %1149 }
0x1d01   :  { %vm1151_vm1 = vcmp.eq.f32.partialorder %v1148_v15, %v1150_v17  ;;  %v1156_v20 = vcvt.f32.s32 %v1150_v17 }
0x1d02   :  { %v1152_v19 = vsel %vm1151_vm1, %v1147_v18, inf }
0x1d03   :  { %1153 = vmin.xlane.f32.xlu1 %v1152_v19  ;;  %v1157_v22 = vshll.u32 %v1156_v20, 16 }
0x1d8c   :  { %v1154_v21 = vpop.xlane.xlu1 %1153 }
0x1d8d   :  { %v1155_v23 = vcvt.f32.s32 %v1154_v21 }
0x1d8f   :  { %v1158_v25 = vadd.s32 %v1157_v22, %v1155_v23 }
0x1d91   :  { %1159 = vst.msk [vmem:[#allocation2] sm:$0xff] %vm769_vm8, %v1158_v25 }
0x1d92 PF:  { %1976 = vset.pattern.permute.xlu0 %v2037_v4  ;;  %1180 = vmatprep.subr.bf16.mxu1 %v2255_v54  ;;  %s1686_s29 = sld [smem:[#allocation3 + $0x3]] }
0x1d93   :  { %1181 = vmatpush1.bf16.msra.mxu1 %v2272_v63  ;;  %1204 = vmatprep.mubr.bf16.mxu1 %v2037_v4 }
0x1d94   :  { %1182 = vmatprep.subr.bf16.mxu1 %v2277_v24  ;;  %1848 = vmatprep.subr.bf16.mxu0 %v2034_v1 }
0x1d95   :  { %1856 = vmatprep.mubr.msk.bf16.mxu0 %vm2035_vm0, %v2034_v1  ;;  %1849 = vmatpush3.bf16.msra.mxu0 %v2337_v41 }
0x1d96   :  { %1850 = vmatprep.subr.bf16.mxu0 %v2034_v1 }
0x1d97   :  { %1183 = vmatpush1.bf16.msra.mxu1 %v2287_v7 }
0x1d98   :  { %v1160_v27 = vld [vmem:[#allocation2] sm:$0xff]  ;;  %1184 = vmatprep.subr.bf16.mxu1 %v2294_v9  ;;  %p1687_p9 = scmp.eq.s32.totalorder %s1686_s29, 0 }
0x1d99   :  { %1162 = vperm.xlu0 %1976, %v1160_v27   ;;  %1851 = vmatpush3.bf16.msra.mxu0 %v2343_v42  ;;  %s2041_s10 = smov (!%p1687_p9), 125  }
0x1d9a   :  { %1852 = vmatprep.subr.bf16.mxu0 %v2034_v1 }
0x1d9b   :  { %1185 = vmatpush1.bf16.msra.mxu1 %v2303_v10 }
0x1d9c   :  { %1186 = vmatprep.subr.bf16.mxu1 %v2309_v11 }
0x1d9d   :  { %1853 = vmatpush3.bf16.msra.mxu0 %v2351_v45 }
0x1d9e   :  { %1854 = vmatprep.subr.bf16.mxu0 %v2034_v1 }
0x1d9f   :  { %1187 = vmatpush1.bf16.msra.mxu1 %v2316_v13 }
0x1da1   :  { %1855 = vmatpush3.bf16.msra.mxu0 %v2358_v46 }
0x1e14   :  { %v1163_v29 = vpop.permute.xlu0 %1162 }
0x1e15   :  { %vm1164_vm3 = vcmp.eq.s32.totalorder %v1163_v29, %v2281_v6 }
0x1e16   :  { %v1682_v30 = vsel %vm1164_vm3, 1.0, %v2034_v1 }
0x1e17   :  { %v1167_v31 = vsel %vm101_vm2, %v1682_v30, %v2411_v55 }
0x1e18   :  { %v1168_v32 = vpack.c.bf16 %v1167_v31, %v1167_v31 }
0x1e1a   :  { %1683 = vmatmul.mubr.msk.bf16.vlgmr.msra.gmra.mxu1 %vm820_vm11, %v1168_v32 }
0x1eda   :  { %v1206_v33 = vpop.f32.mrf.mxu1 }
0x1edb   :  { %v1213_v38 = vadd.f32 %v1206_v33, %v2326_v26 }
0x1edc   :  { %v1208_v34 = vpop.f32.mrf.mxu1 }
0x1edd   :  { %v1221_v35 = vadd.f32 %v1208_v34, %v2328_v28  ;;  %v1214_v39 = vadd.f32 %v1213_v38, %v1208_v34 }
0x1ede   :  { %v1210_v36 = vpop.f32.mrf.mxu1 }
0x1edf   :  { %1223 = vrot.lane.b32.xlu0 %v1221_v35, %s2036_s15  ;;  %v1684_v40 = vmul.f32 -1.442695, %v1214_v39 }
0x1ee0   :  { %v1211_v37 = vpop.f32.mrf.mxu1 }
0x1ee1   :  { %1977 = vpow2.f32 %v1684_v40 }
0x1eee   :  { %v1978_v43 = vpop.eup %1977 }
0x1eef   :  { %v1218_v44 = vadd.f32 1.0, %v1978_v43 }
0x1ef1   :  { %1979 = vrcp.f32 %v1218_v44 }
0x1efe   :  { %v1980_v5 = vpop.eup %1979 }
0x1eff   :  { %v1233_v52 = vsub.f32 1.0, %v1980_v5  ;;  %v1239_v56 = vmul.f32 %v1980_v5, %v2411_v55 }
0x1f51   :  { %v1224_v47 = vpop.permute.xlu0 %1223 }
0x1f52   :  { %v1226_v48 = vmul.f32 %v1980_v5, %v1224_v47 }
0x1f54   :  { %1228 = vrot.lane.b32.xlu1 %v1226_v48, %s2036_s15 }
0x1fc6   :  { %v1229_v49 = vpop.permute.xlu1 %1228 }
0x1fc7   :  { %v1231_v50 = vadd.f32 %v1229_v49, %v1213_v38 }
0x1fc9   :  { %1981 = vtanh.f32 %v1231_v50 }
0x1fd6   :  { %v1982_v51 = vpop.eup %1981 }
0x1fd7   :  { %1235 = vrot.lane.b32.xlu1 %v1982_v51, %s2038_s20 }
0x2049   :  { %v1236_v53 = vpop.permute.xlu1 %1235 }
0x204a   :  { %v1238_v57 = vmul.f32 %v1236_v53, %v1233_v52 }
0x204c   :  { %v2454_v58 = vadd.f32 %v1239_v56, %v1238_v57 }
0x204e   :  { %v1241_v59 = vsel %vm101_vm2, %v1682_v30, %v2454_v58 }
0x204f   :  { %v1242_v60 = vpack.c.bf16 %v1241_v59, %v1241_v59 }
0x2051   :  { %1857 = vmatmul.mubr.msk.bf16.vlgmr.msra.gmra.mxu0 %vm820_vm11, %v1242_v60 }
0x2111   :  { %v1280_v61 = vpop.f32.mrf.mxu0 }
0x2112   :  { %v1281_v62 = vadd.f32 %v1280_v61, %v2371_v2 }
0x2113   :  { %v1858_v0 = vpop.f32.mrf.mxu0  ;;  %1292 = sbr.rel (%p1687_p9) target bundleno = 8589 (0x218d), region = 57 }
0x2114   :  { %1287 = vst [vmem:[#allocation6 + $0x18] sm:$0xff] %v1281_v62 }
0x2115   :  { %v1283_v3 = vpop.f32.mrf.mxu0 }
0x2117   :  { %v1859_v8 = vpop.f32.mrf.mxu0 }
0x2118   :  { %v1293_v55 = vld [vmem:[%s2549_s3] sm:$0xff] }
0x2119   :  { %1294 = vrot.lane.b32.xlu0 %v1293_v55, %s2041_s10 }
0x218b   :  { %v1295_v12 = vpop.permute.xlu0 %1294 }
0x218c   :  { %1296 = vst.msk [vmem:[#allocation2] sm:$0xff] %vm769_vm8, %v1295_v12 }
0x218d PF:  { %p1688_p10 = scmp.ne.s32.totalorder %s1686_s29, 0 }
0x218f   :  { %1300 = sbr.rel (%p1688_p10) target bundleno = 9023 (0x233f), region = 61 }
0x2194   :  { %1301 = vmax.xlane.f32.xlu0 %v1281_v62 }
0x221d   :  { %v1302_v14 = vpop.xlane.xlu0 %1301 }
0x221e   :  { %vm1303_vm4 = vcmp.eq.f32.partialorder %v1281_v62, %v1302_v14 }
0x221f   :  { %v1304_v15 = vsel %vm1303_vm4, %v2281_v6, 128 }
0x2220   :  { %v1306_v16 = vshra.s32 %v1304_v15, 16  ;;  %v1305_v18 = vand.u32 65535, %v1304_v15 }
0x2222   :  { %v1308_v17 = vcvt.s32.f32 %v1306_v16  ;;  %v1307_v20 = vcvt.s32.f32 %v1305_v18 }
0x2224   :  { %1309 = vmin.xlane.f32.xlu0 %v1308_v17 }
0x22ad   :  { %v1310_v19 = vpop.xlane.xlu0 %1309 }
0x22ae   :  { %vm1311_vm5 = vcmp.eq.f32.partialorder %v1308_v17, %v1310_v19  ;;  %v1316_v22 = vcvt.f32.s32 %v1310_v19 }
0x22af   :  { %v1312_v21 = vsel %vm1311_vm5, %v1307_v20, inf }
0x22b0   :  { %1313 = vmin.xlane.f32.xlu1 %v1312_v21  ;;  %v1317_v25 = vshll.u32 %v1316_v22, 16 }
0x2339   :  { %v1314_v23 = vpop.xlane.xlu1 %1313 }
0x233a   :  { %v1315_v27 = vcvt.f32.s32 %v1314_v23 }
0x233c   :  { %v1318_v29 = vadd.s32 %v1317_v25, %v1315_v27 }
0x233e   :  { %1319 = vst.msk [vmem:[#allocation2] sm:$0xff] %vm769_vm8, %v1318_v29 }
0x233f PF:  { %1983 = vset.pattern.permute.xlu0 %v2037_v4  ;;  %1340 = vmatprep.subr.bf16.mxu1 %v2255_v54  ;;  %s1693_s11 = sld [smem:[#allocation3 + $0x4]] }
0x2340   :  { %1341 = vmatpush1.bf16.msra.mxu1 %v2272_v63  ;;  %1364 = vmatprep.mubr.bf16.mxu1 %v2037_v4 }
0x2341   :  { %1342 = vmatprep.subr.bf16.mxu1 %v2277_v24  ;;  %1860 = vmatprep.subr.bf16.mxu0 %v2034_v1 }
0x2342   :  { %1868 = vmatprep.mubr.msk.bf16.mxu0 %vm2035_vm0, %v2034_v1  ;;  %1861 = vmatpush3.bf16.msra.mxu0 %v2337_v41 }
0x2343   :  { %1862 = vmatprep.subr.bf16.mxu0 %v2034_v1 }
0x2344   :  { %1343 = vmatpush1.bf16.msra.mxu1 %v2287_v7 }
0x2345   :  { %v1320_v30 = vld [vmem:[#allocation2] sm:$0xff]  ;;  %1344 = vmatprep.subr.bf16.mxu1 %v2294_v9  ;;  %p1694_p11 = scmp.eq.s32.totalorder %s1693_s11, 0 }
0x2346   :  { %1322 = vperm.xlu0 %1983, %v1320_v30   ;;  %1863 = vmatpush3.bf16.msra.mxu0 %v2343_v42  ;;  %s2042_s5 = smov (!%p1694_p11), 124  }
0x2347   :  { %1864 = vmatprep.subr.bf16.mxu0 %v2034_v1 }
0x2348   :  { %1345 = vmatpush1.bf16.msra.mxu1 %v2303_v10 }
0x2349   :  { %1346 = vmatprep.subr.bf16.mxu1 %v2309_v11 }
0x234a   :  { %1865 = vmatpush3.bf16.msra.mxu0 %v2351_v45 }
0x234b   :  { %1866 = vmatprep.subr.bf16.mxu0 %v2034_v1 }
0x234c   :  { %1347 = vmatpush1.bf16.msra.mxu1 %v2316_v13 }
0x234e   :  { %1867 = vmatpush3.bf16.msra.mxu0 %v2358_v46 }
0x23c1   :  { %v1323_v31 = vpop.permute.xlu0 %1322 }
0x23c2   :  { %vm1324_vm6 = vcmp.eq.s32.totalorder %v1323_v31, %v2281_v6 }
0x23c3   :  { %v1689_v32 = vsel %vm1324_vm6, 1.0, %v2034_v1 }
0x23c4   :  { %v1327_v33 = vsel %vm101_vm2, %v1689_v32, %v2454_v58 }
0x23c5   :  { %v1328_v34 = vpack.c.bf16 %v1327_v33, %v1327_v33 }
0x23c7   :  { %1690 = vmatmul.mubr.msk.bf16.vlgmr.msra.gmra.mxu1 %vm820_vm11, %v1328_v34 }
0x2487   :  { %v1366_v35 = vpop.f32.mrf.mxu1 }
0x2488   :  { %v1373_v40 = vadd.f32 %v1366_v35, %v2326_v26 }
0x2489   :  { %v1368_v36 = vpop.f32.mrf.mxu1 }
0x248a   :  { %v1381_v37 = vadd.f32 %v1368_v36, %v2328_v28  ;;  %v1374_v43 = vadd.f32 %v1373_v40, %v1368_v36 }
0x248b   :  { %v1370_v38 = vpop.f32.mrf.mxu1 }
0x248c   :  { %1383 = vrot.lane.b32.xlu0 %v1381_v37, %s2036_s15  ;;  %v1691_v44 = vmul.f32 -1.442695, %v1374_v43 }
0x248d   :  { %v1371_v39 = vpop.f32.mrf.mxu1 }
0x248e   :  { %1984 = vpow2.f32 %v1691_v44 }
0x249b   :  { %v1985_v5 = vpop.eup %1984 }
0x249c   :  { %v1378_v47 = vadd.f32 1.0, %v1985_v5 }
0x249e   :  { %1986 = vrcp.f32 %v1378_v47 }
0x24ab   :  { %v1987_v48 = vpop.eup %1986 }
0x24ac   :  { %v1393_v56 = vsub.f32 1.0, %v1987_v48  ;;  %v1399_v59 = vmul.f32 %v1987_v48, %v2454_v58 }
0x24fe   :  { %v1384_v49 = vpop.permute.xlu0 %1383 }
0x24ff   :  { %v1386_v50 = vmul.f32 %v1987_v48, %v1384_v49 }
0x2501   :  { %1388 = vrot.lane.b32.xlu1 %v1386_v50, %s2036_s15 }
0x2573   :  { %v1389_v51 = vpop.permute.xlu1 %1388 }
0x2574   :  { %v1391_v52 = vadd.f32 %v1389_v51, %v1373_v40 }
0x2576   :  { %1988 = vtanh.f32 %v1391_v52 }
0x2583   :  { %v1989_v53 = vpop.eup %1988 }
0x2584   :  { %1395 = vrot.lane.b32.xlu1 %v1989_v53, %s2038_s20 }
0x25f6   :  { %v1396_v57 = vpop.permute.xlu1 %1395 }
0x25f7   :  { %v1398_v60 = vmul.f32 %v1396_v57, %v1393_v56 }
0x25f9   :  { %v2497_v61 = vadd.f32 %v1399_v59, %v1398_v60 }
0x25fb   :  { %v1401_v62 = vsel %vm101_vm2, %v1689_v32, %v2497_v61 }
0x25fc   :  { %v1402_v0 = vpack.c.bf16 %v1401_v62, %v1401_v62 }
0x25fe   :  { %1869 = vmatmul.mubr.msk.bf16.vlgmr.msra.gmra.mxu0 %vm820_vm11, %v1402_v0 }
0x26be   :  { %v1440_v3 = vpop.f32.mrf.mxu0 }
0x26bf   :  { %v1441_v8 = vadd.f32 %v1440_v3, %v2371_v2 }
0x26c0   :  { %v1870_v55 = vpop.f32.mrf.mxu0  ;;  %1452 = sbr.rel (%p1694_p11) target bundleno = 10042 (0x273a), region = 65 }
0x26c1   :  { %1447 = vst [vmem:[#allocation6 + $0x20] sm:$0xff] %v1441_v8 }
0x26c2   :  { %v1443_v12 = vpop.f32.mrf.mxu0 }
0x26c4   :  { %v1871_v14 = vpop.f32.mrf.mxu0 }
0x26c5   :  { %v1453_v58 = vld [vmem:[%s2549_s3] sm:$0xff] }
0x26c6   :  { %1454 = vrot.lane.b32.xlu0 %v1453_v58, %s2042_s5 }
0x2738   :  { %v1455_v15 = vpop.permute.xlu0 %1454 }
0x2739   :  { %1456 = vst.msk [vmem:[#allocation2] sm:$0xff] %vm769_vm8, %v1455_v15 }
0x273a PF:  { %p1695_p12 = scmp.ne.s32.totalorder %s1693_s11, 0 }
0x273c   :  { %1460 = sbr.rel (%p1695_p12) target bundleno = 10476 (0x28ec), region = 69 }
0x2741   :  { %1461 = vmax.xlane.f32.xlu0 %v1441_v8 }
0x27ca   :  { %v1462_v16 = vpop.xlane.xlu0 %1461 }
0x27cb   :  { %vm1463_vm7 = vcmp.eq.f32.partialorder %v1441_v8, %v1462_v16 }
0x27cc   :  { %v1464_v17 = vsel %vm1463_vm7, %v2281_v6, 128 }
0x27cd   :  { %v1466_v18 = vshra.s32 %v1464_v17, 16  ;;  %v1465_v20 = vand.u32 65535, %v1464_v17 }
0x27cf   :  { %v1468_v19 = vcvt.s32.f32 %v1466_v18  ;;  %v1467_v22 = vcvt.s32.f32 %v1465_v20 }
0x27d1   :  { %1469 = vmin.xlane.f32.xlu0 %v1468_v19 }
0x285a   :  { %v1470_v21 = vpop.xlane.xlu0 %1469 }
0x285b   :  { %vm1471_vm9 = vcmp.eq.f32.partialorder %v1468_v19, %v1470_v21  ;;  %v1476_v25 = vcvt.f32.s32 %v1470_v21 }
0x285c   :  { %v1472_v23 = vsel %vm1471_vm9, %v1467_v22, inf }
0x285d   :  { %1473 = vmin.xlane.f32.xlu1 %v1472_v23  ;;  %v1477_v29 = vshll.u32 %v1476_v25, 16 }
0x28e6   :  { %v1474_v27 = vpop.xlane.xlu1 %1473 }
0x28e7   :  { %v1475_v30 = vcvt.f32.s32 %v1474_v27 }
0x28e9   :  { %v1478_v31 = vadd.s32 %v1477_v29, %v1475_v30 }
0x28eb   :  { %1479 = vst.msk [vmem:[#allocation2] sm:$0xff] %vm769_vm8, %v1478_v31 }
0x28ec PF:  { %1990 = vset.pattern.permute.xlu0 %v2037_v4  ;;  %1500 = vmatprep.subr.bf16.mxu1 %v2255_v54  ;;  %s2043_s3 = smov [#allocation6]  }
0x28ed   :  { %1501 = vmatpush1.bf16.msra.mxu1 %v2272_v63  ;;  %1524 = vmatprep.mubr.bf16.mxu1 %v2037_v4  ;;  %s1613_s12 = sshll.u32 %s2043_s3, 4  ;;  %s1614_s12 = int_to_ptr.vmem [resolvable:$true] %s1613_s12 }
0x28ee   :  { %1502 = vmatprep.subr.bf16.mxu1 %v2277_v24  ;;  %1872 = vmatprep.subr.bf16.mxu0 %v2034_v1  ;;  %p2014_p0 = scmp.lt.s32.totalorder %s1614_s12, %s1614_s12 }
0x28ef   :  { %1880 = vmatprep.mubr.msk.bf16.mxu0 %vm2035_vm0, %v2034_v1  ;;  %1873 = vmatpush3.bf16.msra.mxu0 %v2337_v41 }
0x28f0   :  { %1874 = vmatprep.subr.bf16.mxu0 %v2034_v1 }
0x28f1   :  { %1503 = vmatpush1.bf16.msra.mxu1 %v2287_v7 }
0x28f2   :  { %v1480_v32 = vld [vmem:[#allocation2] sm:$0xff]  ;;  %1504 = vmatprep.subr.bf16.mxu1 %v2294_v9 }
0x28f3   :  { %1482 = vperm.xlu0 %1990, %v1480_v32   ;;  %1875 = vmatpush3.bf16.msra.mxu0 %v2343_v42 }
0x28f4   :  { %1876 = vmatprep.subr.bf16.mxu0 %v2034_v1 }
0x28f5   :  { %1505 = vmatpush1.bf16.msra.mxu1 %v2303_v10 }
0x28f6   :  { %1506 = vmatprep.subr.bf16.mxu1 %v2309_v11 }
0x28f7   :  { %1877 = vmatpush3.bf16.msra.mxu0 %v2351_v45 }
0x28f8   :  { %1878 = vmatprep.subr.bf16.mxu0 %v2034_v1 }
0x28f9   :  { %1507 = vmatpush1.bf16.msra.mxu1 %v2316_v13 }
0x28fb   :  { %1879 = vmatpush3.bf16.msra.mxu0 %v2358_v46 }
0x296e   :  { %v1483_v4 = vpop.permute.xlu0 %1482 }
0x296f   :  { %vm1484_vm0 = vcmp.eq.s32.totalorder %v1483_v4, %v2281_v6 }
0x2970   :  { %v1696_v54 = vsel %vm1484_vm0, 1.0, %v2034_v1 }
0x2971   :  { %v1487_v63 = vsel %vm101_vm2, %v1696_v54, %v2497_v61 }
0x2972   :  { %v1488_v24 = vpack.c.bf16 %v1487_v63, %v1487_v63 }
0x2974   :  { %1697 = vmatmul.mubr.msk.bf16.vlgmr.msra.gmra.mxu1 %vm820_vm11, %v1488_v24 }
0x2a34   :  { %v1526_v7 = vpop.f32.mrf.mxu1 }
0x2a35   :  { %v1533_v41 = vadd.f32 %v1526_v7, %v2326_v26 }
0x2a36   :  { %v1528_v9 = vpop.f32.mrf.mxu1 }
0x2a37   :  { %v1541_v10 = vadd.f32 %v1528_v9, %v2328_v28  ;;  %v1534_v42 = vadd.f32 %v1533_v41, %v1528_v9 }
0x2a38   :  { %v1530_v11 = vpop.f32.mrf.mxu1 }
0x2a39   :  { %1543 = vrot.lane.b32.xlu0 %v1541_v10, %s2036_s15  ;;  %v1698_v6 = vmul.f32 -1.442695, %v1534_v42 }
0x2a3a   :  { %v1531_v13 = vpop.f32.mrf.mxu1 }
0x2a3b   :  { %1991 = vpow2.f32 %v1698_v6 }
0x2a48   :  { %v1992_v1 = vpop.eup %1991 }
0x2a49   :  { %v1538_v45 = vadd.f32 1.0, %v1992_v1 }
0x2a4b   :  { %1993 = vrcp.f32 %v1538_v45 }
0x2a58   :  { %v1994_v46 = vpop.eup %1993 }
0x2a59   :  { %v1553_v37 = vsub.f32 1.0, %v1994_v46  ;;  %v1559_v26 = vmul.f32 %v1994_v46, %v2497_v61 }
0x2aab   :  { %v1544_v33 = vpop.permute.xlu0 %1543 }
0x2aac   :  { %v1546_v34 = vmul.f32 %v1994_v46, %v1544_v33 }
0x2aae   :  { %1548 = vrot.lane.b32.xlu1 %v1546_v34, %s2036_s15  ;;  %s2009_s15 = scalar_lea.vmem %s1614_s12, 768 }
0x2aaf   :  { %p2010_p13 = scmp.ne.s32.totalorder %s1614_s12, %s2009_s15  ;;  %p2015_p1 = scmp.lt.s32.totalorder %s2009_s15, %s2009_s15 }
0x2ab1   :  { %p2016_p2 = por %p2015_p1, %p2014_p0 }
0x2ab3   :  { %p2017_p3 = pnand %p2016_p2, %p2010_p13 }
0x2b20   :  { %v1549_v35 = vpop.permute.xlu1 %1548 }
0x2b21   :  { %v1551_v36 = vadd.f32 %v1549_v35, %v1533_v41 }
0x2b23   :  { %1995 = vtanh.f32 %v1551_v36 }
0x2b30   :  { %v1996_v28 = vpop.eup %1995 }
0x2b31   :  { %1555 = vrot.lane.b32.xlu1 %v1996_v28, %s2038_s20 }
0x2ba3   :  { %v1556_v38 = vpop.permute.xlu1 %1555 }
0x2ba4   :  { %v1558_v39 = vmul.f32 %v1556_v38, %v1553_v37 }
0x2ba6   :  { %v1560_v40 = vadd.f32 %v1559_v26, %v1558_v39 }
0x2ba8   :  { %v1561_v43 = vsel %vm101_vm2, %v1696_v54, %v1560_v40 }
0x2ba9   :  { %v1562_v44 = vpack.c.bf16 %v1561_v43, %v1561_v43 }
0x2bab   :  { %1881 = vmatmul.mubr.msk.bf16.vlgmr.msra.gmra.mxu0 %vm820_vm11, %v1562_v44 }
0x2c6b   :  { %v1600_v5 = vpop.f32.mrf.mxu0 }
0x2c6c   :  { %v1601_v47 = vadd.f32 %v1600_v5, %v2371_v2 }
0x2c6d   :  { %v1882_v48 = vpop.f32.mrf.mxu0 }
0x2c6e   :  { %1607 = vst [vmem:[#allocation6 + $0x28] sm:$0xff] %v1601_v47 }
0x2c6f   :  { %v1603_v49 = vpop.f32.mrf.mxu0 }
0x2c70   :  { %2020 = shalt.err (!%p2017_p3)
}
0x2c71   :  { %s2044_s20 = smov 128   ;;  %s2045_s13 = smov 8   ;;  %v1883_v50 = vpop.f32.mrf.mxu0 }
0x2c72   :  { %1619 = dma.vmem_to_hbm [thread:$0]  %s1614_s12, 768, %s2554_s8, [#allocation4], %s2044_s20, %s2044_s20, %s2045_s13  }
0x2c73   :  { %2031 = dma.done.wait [#allocation4], 768  }
0x2c74   :  { %2032 = vsyncadd [#allocation4], 4294966528 }
0x2c75   :  { %1623 = vsyncpa [#allocation4], 1 }
0x2c76   :  { %1624 = vsyncpa [#allocation5], 1 }

</bundles_post_ra>
